<compile_context>
chip_gen: v7x
topology: tpu7x:2x2x1
jax: 0.10.0
libtpu: 0.0.40
codegen_flags: <defaults>
</compile_context>

<pallas_src>
import math

import jax
import jax.numpy as jnp
from jax.experimental import pallas as pl
from jax.experimental.pallas import tpu as pltpu


def _rf_kernel(t_ref, x_ref, z1_ref, w_ref, b_ref, tb_ref, psum_ref):
    """One grid step handles one tile of TN output features.

    t_ref    : (B_pad, 1)   f32  per-sample time (resident)
    x_ref    : (B_pad, D)   f32  data, flattened  (resident)
    z1_ref   : (B_pad, D)   f32  noise, flattened (resident)
    w_ref    : (D, TN)      bf16 weight tile (streamed over the grid)
    b_ref    : (1, TN)      f32  bias tile
    tb_ref   : (1, TN)      f32  time-conditioning bias tile
    psum_ref : (1, B_pad, 1) f32 per-tile partial sum of squared error
    """
    t = t_ref[...]                        # (B_pad, 1), broadcasts over features
    x = x_ref[...]                        # (B_pad, D)
    z1 = z1_ref[...]                      # (B_pad, D)

    # Reuse the noise-minus-data term:  d = z1 - x,  zt = x + t*d.
    d = z1 - x
    zt = x + t * d                        # == (1 - t) * x + t * z1, fewer ops

    # Synthetic model, this output tile only:
    #   vtheta_tile = zt @ W[:, tile] + b[tile] + t * tb[tile]
    # bf16 MXU inputs, f32 accumulation.
    v = jnp.dot(zt.astype(jnp.bfloat16), w_ref[...],
                preferred_element_type=jnp.float32)          # (B_pad, TN) f32
    v = v + b_ref[...] + t * tb_ref[...]

    # diff restricted to this tile of output columns: (z1 - x)[:, tile] - v
    tn = v.shape[1]
    off = pl.multiple_of(pl.program_id(0) * tn, tn)
    d_tile = z1_ref[:, pl.ds(off, tn)] - x_ref[:, pl.ds(off, tn)]
    diff = d_tile - v                                         # f32

    # Per-sample partial sum of squares for this tile (f32 accumulation).
    psum_ref[0] = jnp.sum(diff * diff, axis=1, keepdims=True)  # (B_pad, 1)


def rf_forward_pallas(params, x, key):
    """RF forward pass. Returns (mean_loss, t, batchwise_mse)."""
    B, C, H, W = x.shape
    D = C * H * W

    # Stochastic pieces (deterministic given `key`) — glue, not the hot path.
    # TODO(synk): optionally generate z1/t in-kernel with pltpu.prng_* at
    # realistic sizes to skip the HBM round-trip of the noise tensor.
    k_t, k_z1 = jax.random.split(key)
    nt = jax.random.normal(k_t, (B,), dtype=jnp.float32)
    t = jax.nn.sigmoid(nt)                                  # t = sigmoid(randn)
    z1 = jax.random.normal(k_z1, x.shape, dtype=jnp.float32)

    # Pad batch to a multiple of 8 sublanes (padded rows are sliced off below).
    B_pad = max(8, ((B + 7) // 8) * 8)
    pad = B_pad - B
    x_flat = x.reshape(B, D).astype(jnp.float32)
    z1_flat = z1.reshape(B, D).astype(jnp.float32)
    t_pad = t
    if pad:
        x_flat = jnp.pad(x_flat, ((0, pad), (0, 0)))
        z1_flat = jnp.pad(z1_flat, ((0, pad), (0, 0)))
        t_pad = jnp.pad(t, (0, pad))
    t2d = t_pad.reshape(B_pad, 1).astype(jnp.float32)

    # Tile the output-feature axis (multiples of 128; fall back to full D).
    TN = next((tile for tile in (512, 256, 128) if D % tile == 0), D)
    n_tiles = D // TN

    grid_spec = pltpu.PrefetchScalarGridSpec(
        num_scalar_prefetch=0,
        grid=(n_tiles,),
        in_specs=[
            pl.BlockSpec((B_pad, 1), lambda j: (0, 0)),   # t   (resident)
            pl.BlockSpec((B_pad, D), lambda j: (0, 0)),   # x   (resident)
            pl.BlockSpec((B_pad, D), lambda j: (0, 0)),   # z1  (resident)
            pl.BlockSpec((D, TN), lambda j: (0, j)),      # W   (streamed, bf16)
            pl.BlockSpec((1, TN), lambda j: (0, j)),      # b tile
            pl.BlockSpec((1, TN), lambda j: (0, j)),      # tb tile
        ],
        out_specs=pl.BlockSpec((1, B_pad, 1), lambda j: (j, 0, 0)),
    )

    psum = pl.pallas_call(
        _rf_kernel,
        out_shape=jax.ShapeDtypeStruct((n_tiles, B_pad, 1), jnp.float32),
        grid_spec=grid_spec,
        compiler_params=pltpu.CompilerParams(
            dimension_semantics=("parallel",),
        ),
    )(t2d, x_flat, z1_flat, params["w"], params["b"], params["tb"])

    # Tiny wrapper-side reduction over tiles + mean over features.
    batchwise = psum.sum(axis=0)[:, 0] / jnp.float32(D)      # (B_pad,)
    batchwise = batchwise[:B]
    return jnp.mean(batchwise), t, batchwise


def init_params(key, D):
    kw, kb = jax.random.split(key)
    w = (jax.random.normal(kw, (D, D), dtype=jnp.float32)
         / math.sqrt(D)).astype(jnp.bfloat16)                # streamed as bf16
    b = jnp.zeros((1, D), dtype=jnp.float32)
    tb = jax.random.normal(kb, (1, D), dtype=jnp.float32) * 0.02
    return {"w": w, "b": b, "tb": tb}


def _reference(params, x, key):
    """Pure-JAX reference (same RNG draws, same bf16 matmul inputs)."""
    B, C, H, W = x.shape
    D = C * H * W
    k_t, k_z1 = jax.random.split(key)
    nt = jax.random.normal(k_t, (B,), dtype=jnp.float32)
    t = jax.nn.sigmoid(nt)
    z1 = jax.random.normal(k_z1, x.shape, dtype=jnp.float32)
    xf = x.reshape(B, D).astype(jnp.float32)
    z1f = z1.reshape(B, D)
    texp = t[:, None]
    d = z1f - xf
    zt = xf + texp * d
    vtheta = jnp.dot(zt.astype(jnp.bfloat16), params["w"],
                     preferred_element_type=jnp.float32)
    vtheta = vtheta + params["b"] + texp * params["tb"]
    bm = jnp.mean((d - vtheta) ** 2, axis=1)
    return jnp.mean(bm), t, bm


if __name__ == "__main__":
    # Small shapes: batch=2, channels=4, spatial=16x16  ->  D = 1024
    B, C, H, W = 2, 4, 16, 16
    D = C * H * W

    root = jax.random.PRNGKey(0)
    k_x, k_params, k_fwd = jax.random.split(root, 3)

    x = jax.random.normal(k_x, (B, C, H, W), dtype=jnp.float32)
    params = init_params(k_params, D)

    loss, t, batchwise = rf_forward_pallas(params, x, k_fwd)
    jax.block_until_ready((loss, t, batchwise))

    # Match the PyTorch return structure:
    # (mean_loss, {'batchwise_loss': [(t, mse), ...]})
    ttloss = [(float(tv), float(lv)) for tv, lv in zip(t, batchwise)]
    result = (loss, {"batchwise_loss": ttloss})

    # Sanity check against a pure-JAX reference.
    ref_loss, _, ref_bm = _reference(params, x, k_fwd)
    assert jnp.allclose(loss, ref_loss, rtol=1e-3, atol=1e-3), (loss, ref_loss)
    assert jnp.allclose(batchwise, ref_bm, rtol=1e-3, atol=1e-3)

    print("KERNEL_OK")
</pallas_src>

<mosaic_0001>
module attributes {stable_mosaic.version = 11 : i64} {
  func.func @_rf_kernel(%arg0: i32, %arg1: memref<8x1xf32, #tpu.memory_space<vmem>>, %arg2: memref<8x1024xf32, #tpu.memory_space<vmem>>, %arg3: memref<8x1024xf32, #tpu.memory_space<vmem>>, %arg4: memref<1024x512xbf16, #tpu.memory_space<vmem>>, %arg5: memref<1x512xf32, #tpu.memory_space<vmem>>, %arg6: memref<1x512xf32, #tpu.memory_space<vmem>>, %arg7: memref<1x8x1xf32, #tpu.memory_space<vmem>>) attributes {dimension_semantics = [#tpu.dimension_semantics<parallel>], iteration_bounds = array<i64: 2>, scalar_prefetch = 0 : i64, scratch_operands = 0 : i64, tpu.core_type = #tpu.core_type<tc>, window_params = [{pipeline_mode = #tpu.pipeline_mode<synchronous>, transform_indices = @transform_0, window_bounds = array<i64: 8, 1>}, {pipeline_mode = #tpu.pipeline_mode<synchronous>, transform_indices = @transform_1, window_bounds = array<i64: 8, 1024>}, {pipeline_mode = #tpu.pipeline_mode<synchronous>, transform_indices = @transform_2, window_bounds = array<i64: 8, 1024>}, {transform_indices = @transform_3, window_bounds = array<i64: 1024, 512>}, {transform_indices = @transform_4, window_bounds = array<i64: 1, 512>}, {transform_indices = @transform_5, window_bounds = array<i64: 1, 512>}, {transform_indices = @transform_6, window_bounds = array<i64: 1, 8, 1>}]} {
    %c0 = arith.constant 0 : index
    %c0_0 = arith.constant 0 : index
    %0 = vector.load %arg1[%c0, %c0_0] : memref<8x1xf32, #tpu.memory_space<vmem>>, vector<8x1xf32>
    %c0_1 = arith.constant 0 : index
    %c0_2 = arith.constant 0 : index
    %1 = vector.load %arg2[%c0_1, %c0_2] : memref<8x1024xf32, #tpu.memory_space<vmem>>, vector<8x1024xf32>
    %c0_3 = arith.constant 0 : index
    %c0_4 = arith.constant 0 : index
    %2 = vector.load %arg3[%c0_3, %c0_4] : memref<8x1024xf32, #tpu.memory_space<vmem>>, vector<8x1024xf32>
    %3 = arith.subf %2, %1 : vector<8x1024xf32>
    %4 = vector.broadcast %0 : vector<8x1xf32> to vector<8x1024xf32>
    %5 = arith.mulf %4, %3 : vector<8x1024xf32>
    %6 = arith.addf %1, %5 : vector<8x1024xf32>
    %7 = arith.truncf %6 : vector<8x1024xf32> to vector<8x1024xbf16>
    %c0_5 = arith.constant 0 : index
    %c0_6 = arith.constant 0 : index
    %8 = vector.load %arg4[%c0_5, %c0_6] : memref<1024x512xbf16, #tpu.memory_space<vmem>>, vector<1024x512xbf16>
    %cst = arith.constant dense<0.000000e+00> : vector<8x512xf32>
    %9 = tpu.matmul %7, %8, %cst {dimension_numbers = #tpu.dot_dimension_numbers<[1], [0], [0], [1], [0, 0, 1, 1], [], []>} : vector<8x1024xbf16>, vector<1024x512xbf16>, vector<8x512xf32> -> vector<8x512xf32>
    %c0_7 = arith.constant 0 : index
    %c0_8 = arith.constant 0 : index
    %10 = vector.load %arg5[%c0_7, %c0_8] : memref<1x512xf32, #tpu.memory_space<vmem>>, vector<1x512xf32>
    %11 = vector.broadcast %10 : vector<1x512xf32> to vector<8x512xf32>
    %12 = arith.addf %9, %11 : vector<8x512xf32>
    %c0_9 = arith.constant 0 : index
    %c0_10 = arith.constant 0 : index
    %13 = vector.load %arg6[%c0_9, %c0_10] : memref<1x512xf32, #tpu.memory_space<vmem>>, vector<1x512xf32>
    %14 = vector.broadcast %0 : vector<8x1xf32> to vector<8x512xf32>
    %15 = vector.broadcast %13 : vector<1x512xf32> to vector<8x512xf32>
    %16 = arith.mulf %14, %15 : vector<8x512xf32>
    %17 = arith.addf %12, %16 : vector<8x512xf32>
    %c512_i32 = arith.constant 512 : i32
    %18 = arith.muli %arg0, %c512_i32 : i32
    %19 = tpu.assume_multiple %18, 512 : i32
    %c0_11 = arith.constant 0 : index
    %20 = arith.index_cast %19 : i32 to index
    %21 = vector.load %arg3[%c0_11, %20] : memref<8x1024xf32, #tpu.memory_space<vmem>>, vector<8x512xf32>
    %c0_12 = arith.constant 0 : index
    %22 = arith.index_cast %19 : i32 to index
    %23 = vector.load %arg2[%c0_12, %22] : memref<8x1024xf32, #tpu.memory_space<vmem>>, vector<8x512xf32>
    %24 = arith.subf %21, %23 : vector<8x512xf32>
    %25 = arith.subf %24, %17 : vector<8x512xf32>
    %26 = arith.mulf %25, %25 : vector<8x512xf32>
    %cst_13 = arith.constant dense<0.000000e+00> : vector<8xf32>
    %27 = vector.multi_reduction <add>, %26, %cst_13 [1] : vector<8x512xf32> to vector<8xf32>
    %28 = vector.shape_cast %27 : vector<8xf32> to vector<8x1xf32>
    %c0_14 = arith.constant 0 : index
    %c0_15 = arith.constant 0 : index
    %c0_16 = arith.constant 0 : index
    %29 = vector.load %arg7[%c0_14, %c0_15, %c0_16] : memref<1x8x1xf32, #tpu.memory_space<vmem>>, vector<1x8x1xf32>
    %30 = vector.shape_cast %29 : vector<1x8x1xf32> to vector<8x1xf32>
    %31 = vector.shape_cast %28 : vector<8x1xf32> to vector<1x8x1xf32>
    tpu.vector_store %arg7[%c0_14, %c0_15, %c0_16], %31 {strides = array<i32>} : memref<1x8x1xf32, #tpu.memory_space<vmem>>, vector<1x8x1xf32>,
    return
  }
  func.func @transform_0(%arg0: i32) -> (i32, i32) {
    %c0_i32 = arith.constant 0 : i32
    %c0_i32_0 = arith.constant 0 : i32
    %c0_i32_1 = arith.constant 0 : i32
    return %c0_i32, %c0_i32_0 : i32, i32
  }
  func.func @transform_1(%arg0: i32) -> (i32, i32) {
    %c0_i32 = arith.constant 0 : i32
    %c0_i32_0 = arith.constant 0 : i32
    %c0_i32_1 = arith.constant 0 : i32
    return %c0_i32, %c0_i32_0 : i32, i32
  }
  func.func @transform_2(%arg0: i32) -> (i32, i32) {
    %c0_i32 = arith.constant 0 : i32
    %c0_i32_0 = arith.constant 0 : i32
    %c0_i32_1 = arith.constant 0 : i32
    return %c0_i32, %c0_i32_0 : i32, i32
  }
  func.func @transform_3(%arg0: i32) -> (i32, i32) {
    %c0_i32 = arith.constant 0 : i32
    %c0_i32_0 = arith.constant 0 : i32
    return %c0_i32, %arg0 : i32, i32
  }
  func.func @transform_4(%arg0: i32) -> (i32, i32) {
    %c0_i32 = arith.constant 0 : i32
    %c0_i32_0 = arith.constant 0 : i32
    return %c0_i32, %arg0 : i32, i32
  }
  func.func @transform_5(%arg0: i32) -> (i32, i32) {
    %c0_i32 = arith.constant 0 : i32
    %c0_i32_0 = arith.constant 0 : i32
    return %c0_i32, %arg0 : i32, i32
  }
  func.func @transform_6(%arg0: i32) -> (i32, i32, i32) {
    %c0_i32 = arith.constant 0 : i32
    %c0_i32_0 = arith.constant 0 : i32
    %c0_i32_1 = arith.constant 0 : i32
    return %arg0, %c0_i32, %c0_i32_0 : i32, i32, i32
  }
}

</mosaic_0001>

<bundles_post_ra>
// kernel: tpu_custom_call.1
= control target key start
LH: loop header
LB: loop body
LE: loop exit
PB: predicated region body
PF: predicated region fallthrough
CT: control target
= control target key end

     0   :  { %s4043_s0 = inlined_call_operand.vmem [shape: f32[8,1], index: 0, kind: input, shape index: {}]   ;;  %s4044_s1 = inlined_call_operand.hbm [shape: f32[8,1024], index: 1, kind: input, shape index: {}]   ;;  %s4045_s2 = inlined_call_operand.hbm [shape: f32[8,1024], index: 2, kind: input, shape index: {}]   ;;  %s4046_s3 = inlined_call_operand.hbm [shape: bf16[1024,1024], index: 3, kind: input, shape index: {}]   ;;  %s4047_s4 = inlined_call_operand.hbm [shape: f32[1,1024], index: 4, kind: input, shape index: {}]   ;;  %s4048_s5 = inlined_call_operand.hbm [shape: f32[1,1024], index: 5, kind: input, shape index: {}]   ;;  %s4049_s6 = inlined_call_operand.vmem [shape: f32[2,8,1], index: 6, kind: output, shape index: {}]  }
   0x1   :  { %4060 = sst [smem:[#allocation12_spill]] %s4044_s1 }
   0x2   :  { %4061 = sst [smem:[#allocation13_spill]] %s4046_s3 }
   0x3   :  { %11 = vsyncpa [#allocation3], 0 }
   0x4   :  { %12 = vsyncpa [#allocation5], 0  ;;  %s3476_s21 = smov 0   ;;  %s3478_s22 = smov 0  }
   0x5   :  { %s3480_s23 = smov 0   ;;  %s3482_s24 = smov 0  }
   0x6 LB: > { %s3495_s25 = sadd.s32 4294967295, %s3430_s24   ;;  %s3498_s26 = sadd.s32 1, %s3430_s24   ;;  %s3430_s24 = sphi %s3482_s24, %s4086_s24   ;;  %s3426_s23 = sphi %s3480_s23, %s4085_s23   ;;  %s3422_s22 = sphi %s3478_s22, %s4084_s22   ;;  %s3418_s21 = sphi %s3476_s21, %s4083_s21  }
   0x7   : > { %s85_s27 = ssub.s32 %s3430_s24, %s3498_s26  ;;  %s88_s28 = sadd.s32 1, %s3426_s23 }
   0x8   : > { %p86_p0 = scmp.eq.s32.totalorder %s85_s27, 0  ;;  %p95_p1 = scmp.ne.s32.totalorder %s3426_s23, %s3422_s22 }
   0x9   : > { %p96_p2 = scmp.eq.s32.totalorder %s3430_s24, 0  ;;  %p101_p3 = scmp.ne.s32.totalorder %s3422_s22, %s3418_s21 }
   0xa   : > { %s3508_s29 = scalar_select %p86_p0, %s3426_s23, %s88_s28  }
   0xb   : > { %p3510_p4 = por %p96_p2, %p95_p1  ;;  %p4050_p5 = scmp.eq.s32.totalorder %s3495_s25, 0 }
   0xc   : > { %p2499_p6 = scmp.ge.s32.totalorder %s3430_s24, 1  ;;  %p190_p7 = scmp.lt.s32.totalorder %s3430_s24, 3 }
   0xd   : > { %p3519_p8 = por %p4050_p5, %p101_p3  ;;  %s3432_s9 = smov [#allocation2]  }
   0xe   : > { %p3523_p9 = pnand %p2499_p6, %p190_p7  ;;  %s206_s10 = sshll.u32 %s3432_s9, 4  ;;  %s207_s10 = int_to_ptr.vmem [resolvable:$true] %s206_s10 }
   0xf   : > { %s4063_s7 = scalar_select %p3519_p8, 1, 0 }
  0x10   : > { %s4064_s8 = scalar_select %p3523_p9, 1, 0 }
  0x11   : > { %p2797_p10 = pneg %p3523_p9  ;;  %p2816_p11 = scmp.lt.s32.totalorder %s3430_s24, 2 }
  0x12   : > { %s228_s11 = sand.u32 1, %s3430_s24   ;;  %s230_s14 = sand.u32 1, %s3426_s23  }
  0x13   : > { %p3533_p12 = pnand %p2797_p10, %p4050_p5  ;;  %p3539_p13 = pnand %p2816_p11, %p3510_p4 }
  0x14   : > { %s2503_s15 = sshll.u32 %s230_s14, 11  ;;  %s4067_s1 = sld [smem:[#allocation12_spill]] }
  0x15   : > { %s4065_s12 = scalar_select %p3533_p12, 1, 0 }
  0x16   : > { %s4066_s13 = scalar_select %p3539_p13, 1, 0 }
  0x17   : > { %p4054_p1 = pneg %p3533_p12 }
  0x1a   : > { %s3242_s18 = scalar_lea.hbm %s4067_s1, 1024 }
  0x1b   : > { %p3243_p0 = scmp.ne.s32.totalorder %s4067_s1, %s3242_s18  ;;  %p3249_p4 = scmp.lt.u32.totalorder %s3242_s18, %s4067_s1 }
  0x1d   : > { %p3245_p2 = pnand %p4054_p1, %p3243_p0 }
  0x1f   : > { %p3246_p3 = pneg %p3245_p2 }
  0x21   : > { %p3251_p6 = pnand %p3249_p4, %p3246_p3 }
  0x23   : > { %3254 = shalt.err (!%p3251_p6)
}
  0x24   : > { %s3255_s28 = scalar_lea.vmem %s207_s10, 1024  ;;  %p3263_p5 = scmp.lt.s32.totalorder %s207_s10, %s207_s10 }
  0x25   : > { %p3256_p7 = scmp.ne.s32.totalorder %s207_s10, %s3255_s28  ;;  %p3264_p8 = scmp.lt.s32.totalorder %s3255_s28, %s3255_s28 }
  0x27   : > { %p3258_p10 = pnand %p3256_p7, %p4054_p1  ;;  %p3265_p9 = por %p3264_p8, %p3263_p5 }
  0x29   : > { %p3259_p11 = pneg %p3258_p10 }
  0x2b   : > { %p3266_p13 = pnand %p3265_p9, %p3259_p11 }
  0x2d   : > { %3269 = shalt.err (!%p3266_p13)
}
  0x2e   : > { %2800 = dma.hbm_to_vmem [thread:$0]  (!%p3533_p12), %s4067_s1, 1024, %s207_s10, [#allocation3]  }
  0x2f   : > { %s2780_s16 = sshll.u32 %s3430_s24, 8  ;;  %s232_s17 = scalar_lea.vmem [#allocation6], %s2503_s15 }
  0x30   : > { %s239_s18 = sshll.u32 %s232_s17, 4  ;;  %s4068_s3 = sld [smem:[#allocation13_spill]]  ;;  %s3572_s18 = int_to_ptr.vmem [resolvable:$true] %s239_s18 }
  0x31   : > { %s3574_s27 = sshll.u32 %s230_s14, 2  ;;  %s3576_s28 = scalar_lea.sflag [#allocation3], %s228_s11 }
  0x32   : > { %p4069_p8 = scmp.ne.s32.totalorder %s4066_s13, 0 }
  0x34   : > { %p3582_p9 = pneg %p4069_p8 }
  0x36   : > { %s3570_s21 = scalar_lea.hbm %s4068_s3, %s2780_s16  ;;  %s3275_s16 = scalar_lea.hbm %s4068_s3, 65536 }
  0x37   : > { %s3270_s30 = scalar_lea.hbm %s3570_s21, 32768  ;;  %p3276_p2 = scmp.lt.u32.totalorder %s3570_s21, %s4068_s3 }
  0x38   : > { %p3271_p5 = scmp.ne.s32.totalorder %s3570_s21, %s3270_s30  ;;  %p3277_p3 = scmp.lt.u32.totalorder %s3275_s16, %s3270_s30 }
  0x39   : > { %s4070_s10 = scalar_select %p3582_p9, 1, 0 }
  0x3a   : > { %p3273_p13 = pnand %p3582_p9, %p3271_p5  ;;  %p3278_p4 = por %p3277_p3, %p3276_p2 }
  0x3b   : > { %p3279_p6 = scmp.lt.u32.totalorder %s3270_s30, %s3570_s21 }
  0x3c   : > { %p3274_p0 = pneg %p3273_p13 }
  0x3d   : > { %p3280_p7 = por %p3279_p6, %p3278_p4 }
  0x3f   : > { %p3281_p10 = pnand %p3280_p7, %p3274_p0 }
  0x41   : > { %3284 = shalt.err (!%p3281_p10)
}
  0x42   : > { %s3285_s11 = scalar_lea.vmem %s3572_s18, 32768  ;;  %s3433_s19 = smov [#allocation6]  }
  0x43   : > { %p3286_p11 = scmp.ne.s32.totalorder %s3572_s18, %s3285_s11  ;;  %s3290_s20 = sshll.u32 %s3433_s19, 4  ;;  %s3291_s20 = int_to_ptr.vmem [resolvable:$false] %s3290_s20 }
  0x44   : > { %s3292_s15 = scalar_lea.vmem %s3291_s20, 65536  ;;  %p3293_p1 = scmp.lt.s32.totalorder %s3572_s18, %s3291_s20 }
  0x45   : > { %p3288_p5 = pnand %p3286_p11, %p3582_p9  ;;  %p3294_p12 = scmp.lt.s32.totalorder %s3292_s15, %s3285_s11 }
  0x47   : > { %p3289_p13 = pneg %p3288_p5  ;;  %p3295_p2 = por %p3294_p12, %p3293_p1 }
  0x49   : > { %p3296_p3 = pnand %p3295_p2, %p3289_p13 }
  0x4b   : > { %3299 = shalt.err (!%p3296_p3)
}
  0x4c   : > { %s3434_s30 = smov 512   ;;  %s3435_s9 = smov 256  }
  0x4d   : > { %s3436_s16 = smov 16   ;;  %s2781_s17 = sshll.u32 %s3430_s24, 6 }
  0x4e   : > { %2807 = dma.hbm_to_vmem [thread:$0]  (!%p4069_p8), %s3570_s21, 32768, %s3572_s18, %s3576_s28, %s3434_s30, %s3435_s9, %s3436_s16  }
  0x4f   : > { %s3612_s19 = scalar_lea.hbm %s4047_s4, %s2781_s17  ;;  %s253_s20 = scalar_lea.vmem [#allocation7], %s3574_s27 }
  0x50   : > { %s261_s15 = sshll.u32 %s253_s20, 4  ;;  %s3300_s1 = scalar_lea.hbm %s3612_s19, 64  ;;  %s262_s15 = int_to_ptr.vmem [resolvable:$true] %s261_s15 }
  0x51   : > { %p3301_p12 = scmp.ne.s32.totalorder %s3612_s19, %s3300_s1  ;;  %s3305_s30 = scalar_lea.hbm %s4047_s4, 128 }
  0x52   : > { %p3306_p4 = scmp.lt.u32.totalorder %s3612_s19, %s4047_s4  ;;  %p3307_p6 = scmp.lt.u32.totalorder %s3305_s30, %s3300_s1 }
  0x53   : > { %p3303_p1 = pnand %p3301_p12, %p3582_p9  ;;  %p3309_p10 = scmp.lt.u32.totalorder %s3300_s1, %s3612_s19 }
  0x54   : > { %p3308_p7 = por %p3307_p6, %p3306_p4 }
  0x55   : > { %p3304_p0 = pneg %p3303_p1 }
  0x56   : > { %p3310_p11 = por %p3309_p10, %p3308_p7 }
  0x58   : > { %p3311_p5 = pnand %p3310_p11, %p3304_p0 }
  0x5a   : > { %3314 = shalt.err (!%p3311_p5)
}
  0x5b   : > { %s3315_s14 = scalar_lea.vmem %s262_s15, 64  ;;  %s3437_s11 = smov [#allocation7]  }
  0x5c   : > { %p3316_p13 = scmp.ne.s32.totalorder %s262_s15, %s3315_s14  ;;  %s3320_s20 = sshll.u32 %s3437_s11, 4  ;;  %s3321_s20 = int_to_ptr.vmem [resolvable:$false] %s3320_s20 }
  0x5d   : > { %s3322_s18 = scalar_lea.vmem %s3321_s20, 128  ;;  %p3323_p12 = scmp.lt.s32.totalorder %s262_s15, %s3321_s20 }
  0x5e   : > { %p3318_p2 = pnand %p3316_p13, %p3582_p9  ;;  %p3324_p1 = scmp.lt.s32.totalorder %s3322_s18, %s3315_s14 }
  0x60   : > { %p3319_p3 = pneg %p3318_p2  ;;  %p3325_p8 = por %p3324_p1, %p3323_p12 }
  0x62   : > { %p3326_p4 = pnand %p3325_p8, %p3319_p3 }
  0x64   : > { %3329 = shalt.err (!%p3326_p4)
}
  0x65   : > { %p4071_p6 = scmp.ne.s32.totalorder %s4066_s13, 0  ;;  %s3438_s1 = smov [#allocation4]  }
  0x66   : > { %s217_s21 = sshll.u32 %s3438_s1, 4  ;;  %s3638_s16 = scalar_lea.hbm %s4048_s5, %s2781_s17  ;;  %s218_s21 = int_to_ptr.vmem [resolvable:$true] %s217_s21 }
  0x67   : > { %2810 = dma.hbm_to_vmem [thread:$0]  (!%p4071_p6), %s3612_s19, 64, %s262_s15, %s3576_s28  }
  0x68   : > { %s3330_s20 = scalar_lea.hbm %s4045_s2, 1024  ;;  %p4072_p0 = scmp.ne.s32.totalorder %s4065_s12, 0 }
  0x69   : > { %p3331_p8 = scmp.ne.s32.totalorder %s4045_s2, %s3330_s20  ;;  %p3337_p5 = scmp.lt.u32.totalorder %s3330_s20, %s4045_s2 }
  0x6a   : > { %p4073_p7 = pneg %p4072_p0 }
  0x6c   : > { %p3333_p10 = pnand %p3331_p8, %p4073_p7 }
  0x6e   : > { %p3334_p11 = pneg %p3333_p10 }
  0x70   : > { %p3339_p13 = pnand %p3337_p5, %p3334_p11 }
  0x72   : > { %3342 = shalt.err (!%p3339_p13)
}
  0x73   : > { %s3343_s24 = scalar_lea.vmem %s218_s21, 1024  ;;  %p4074_p3 = pmov %p4073_p7 }
  0x74   : > { %p3344_p2 = scmp.ne.s32.totalorder %s218_s21, %s3343_s24  ;;  %p3351_p4 = scmp.lt.s32.totalorder %s218_s21, %s218_s21 }
  0x75   : > { %p3352_p6 = scmp.lt.s32.totalorder %s3343_s24, %s3343_s24 }
  0x76   : > { %p3346_p12 = pnand %p3344_p2, %p4074_p3 }
  0x77   : > { %p3353_p9 = por %p3352_p6, %p3351_p4 }
  0x78   : > { %p3347_p1 = pneg %p3346_p12 }
  0x7a   : > { %p3354_p7 = pnand %p3353_p9, %p3347_p1 }
  0x7c   : > { %3357 = shalt.err (!%p3354_p7)
}
  0x7d   : > { %2803 = dma.hbm_to_vmem [thread:$0]  (!%p4072_p0), %s4045_s2, 1024, %s218_s21, [#allocation5]  }
  0x7e   : > { %s272_s1 = scalar_lea.vmem [#allocation8], %s3574_s27  ;;  %s3358_s9 = scalar_lea.hbm %s3638_s16, 64 }
  0x7f   : > { %s280_s30 = sshll.u32 %s272_s1, 4  ;;  %p3359_p8 = scmp.ne.s32.totalorder %s3638_s16, %s3358_s9  ;;  %s281_s30 = int_to_ptr.vmem [resolvable:$true] %s280_s30 }
  0x80   : > { %p4075_p6 = scmp.ne.s32.totalorder %s4070_s10, 0  ;;  %s3363_s11 = scalar_lea.hbm %s4048_s5, 128 }
  0x81   : > { %p3364_p11 = scmp.lt.u32.totalorder %s3638_s16, %s4048_s5  ;;  %p3365_p5 = scmp.lt.u32.totalorder %s3363_s11, %s3358_s9 }
  0x82   : > { %p3361_p9 = pnand %p3359_p8, %p4075_p6  ;;  %p3367_p2 = scmp.lt.u32.totalorder %s3358_s9, %s3638_s16 }
  0x83   : > { %p3366_p13 = por %p3365_p5, %p3364_p11 }
  0x84   : > { %p3362_p10 = pneg %p3361_p9 }
  0x85   : > { %p3368_p0 = por %p3367_p2, %p3366_p13 }
  0x87   : > { %p3369_p3 = pnand %p3368_p0, %p3362_p10 }
  0x89   : > { %3372 = shalt.err (!%p3369_p3)
}
  0x8a   : > { %s3373_s27 = scalar_lea.vmem %s281_s30, 64  ;;  %s3439_s21 = smov [#allocation8]  }
  0x8b   : > { %p3374_p12 = scmp.ne.s32.totalorder %s281_s30, %s3373_s27  ;;  %s3378_s19 = sshll.u32 %s3439_s21, 4  ;;  %s3379_s19 = int_to_ptr.vmem [resolvable:$false] %s3378_s19 }
  0x8c   : > { %s3380_s15 = scalar_lea.vmem %s3379_s19, 128  ;;  %p3381_p7 = scmp.lt.s32.totalorder %s281_s30, %s3379_s19 }
  0x8d   : > { %p3376_p1 = pnand %p3374_p12, %p4075_p6  ;;  %p3382_p8 = scmp.lt.s32.totalorder %s3380_s15, %s3373_s27 }
  0x8f   : > { %p3377_p4 = pneg %p3376_p1  ;;  %p3383_p9 = por %p3382_p8, %p3381_p7 }
  0x91   : > { %p3384_p5 = pnand %p3383_p9, %p3377_p4 }
  0x93   : > { %3387 = shalt.err (!%p3384_p5)
}
  0x94   : > { %p4076_p11 = scmp.ne.s32.totalorder %s4066_s13, 0  ;;  %p4077_p10 = scmp.ne.s32.totalorder %s4064_s8, 0 }
  0x95   : > { %p4078_p6 = scmp.eq.s32.totalorder (!%p4077_p10), %s3495_s25, 0 }
  0x96   : > { %2813 = dma.hbm_to_vmem [thread:$0]  (!%p4076_p11), %s3638_s16, 64, %s281_s30, %s3576_s28  }
  0x97   : > { %289 = sbr.rel (%p4077_p10) target bundleno = 865 (0x361), region = 44 }
  0x9e   : > { %3405 = dma.done.wait (%p4078_p6), [#allocation3], 1024   ;;  %p4079_p13 = pmov %p4078_p6 }
  0x9f   : > { %p4080_p2 = pmov %p4078_p6 }
  0xa0   : > { %3407 = vsyncadd (%p4079_p13), [#allocation3], 4294966272 }
  0xa1   : > { %3409 = dma.done.wait (%p4080_p2), [#allocation5], 1024   ;;  %p4081_p0 = pmov %p4080_p2 }
  0xa2   : > { %s299_s13 = sand.u32 1, %s3495_s25   ;;  %s301_s28 = sand.u32 1, %s3422_s22  }
  0xa3   : > { %3411 = vsyncadd (%p4081_p0), [#allocation5], 4294966272  ;;  %s2515_s8 = sshll.u32 %s301_s28, 11  ;;  %s300_s10 = scalar_lea.sflag [#allocation3], %s299_s13 }
  0xa4   : > { %s3693_s16 = scalar_lea.vmem [#allocation6], %s2515_s8  ;;  %p4082_p3 = scmp.ne.s32.totalorder %s4063_s7, 0 }
  0xa6   : > { %3413 = dma.done.wait (%p4082_p3), %s300_s10, 32896  }
  0xa7   : > { %3415 = vsyncadd (%p4082_p3), %s300_s10, 4294934400  ;;  %v3440_v0 = vmov 0   ;;  %v366_v1 = vld [vmem:[%s4043_s0] sm:$0xff]  ;;  %s2516_s7 = sshll.u32 %s301_s28, 2  ;;  %s2775_s1 = sshll.u32 %s3495_s25, 9  ;;  %vm2368_vm0 = vcmask 7168  }
  0xa8   : > { %2857 = vset.pattern.permute.xlu0 %v3440_v0  ;;  %v2858_v2 = vld [vmem:[%s3693_s16 + $0x4] ss:$16 sps:$4 sm:$0xff]   ;;  %v2862_v4 = vld [vmem:[%s3693_s16] ss:$16 sps:$4 sm:$0xff]   ;;  %s312_s17 = scalar_lea.vmem [#allocation7], %s2516_s7  ;;  %s2337_s30 = sshra.s32 %s2775_s1, 7 }
  0xa9   : > { %393 = vperm.xlu0 %2857, %v366_v1   ;;  %v2860_v3 = vld [vmem:[%s3693_s16 + $0x204] ss:$16 sps:$4 sm:$0xff]   ;;  %v2863_v5 = vld [vmem:[%s3693_s16 + $0x200] ss:$16 sps:$4 sm:$0xff]   ;;  %1978 = vmatprep.subr.bf16.mxu0 %v2858_v2  ;;  %s2776_s9 = sshll.u32 %s2337_s30, 3  ;;  %s321_s14 = scalar_lea.vmem [#allocation8], %s2516_s7 }
  0xaa   : > { %v2864_v6 = vld [vmem:[%s3693_s16 + $0x24] ss:$16 sps:$4 sm:$0xff]   ;;  %2019 = vmatprep.subr.bf16.mxu1 %v2860_v3  ;;  %1979 = vmatpush1.bf16.msra.mxu0 %v2862_v4  ;;  %v2868_v8 = vld [vmem:[%s3693_s16 + $0x20] ss:$16 sps:$4 sm:$0xff]   ;;  %v368_v4 = vld [vmem:[#allocation2 + $0x8] sm:$0xff]  ;;  %s4007_s12 = scalar_lea.vmem [#allocation4], %s2776_s9 }
  0xab   : > { %v2866_v7 = vld [vmem:[%s3693_s16 + $0x224] ss:$16 sps:$4 sm:$0xff]   ;;  %2020 = vmatpush1.bf16.msra.mxu1 %v2863_v5  ;;  %1980 = vmatprep.subr.bf16.mxu0 %v2864_v6  ;;  %v2869_v9 = vld [vmem:[%s3693_s16 + $0x220] ss:$16 sps:$4 sm:$0xff]   ;;  %v376_v5 = vld [vmem:[#allocation4 + $0x8] sm:$0xff]  ;;  %s4010_s11 = scalar_lea.vmem [#allocation2], %s2776_s9 }
  0xac   : > { %2021 = vmatprep.subr.bf16.mxu1 %v2866_v7  ;;  %v2870_v10 = vld [vmem:[%s3693_s16 + $0x44] ss:$16 sps:$4 sm:$0xff]   ;;  %v2874_v12 = vld [vmem:[%s3693_s16 + $0x40] ss:$16 sps:$4 sm:$0xff]   ;;  %v370_v6 = vld [vmem:[#allocation2 + $0x18] sm:$0xff]  ;;  %p362_p12 = scmp.lt.s32.totalorder %s3495_s25, 1 }
  0xad   : > { %v2872_v11 = vld [vmem:[%s3693_s16 + $0x244] ss:$16 sps:$4 sm:$0xff]   ;;  %v2875_v13 = vld [vmem:[%s3693_s16 + $0x240] ss:$16 sps:$4 sm:$0xff]   ;;  %v378_v7 = vld [vmem:[#allocation4 + $0x18] sm:$0xff] }
  0xae   : > { %1981 = vmatpush1.bf16.msra.mxu0 %v2868_v8  ;;  %v2876_v14 = vld [vmem:[%s3693_s16 + $0x64] ss:$16 sps:$4 sm:$0xff]   ;;  %v2880_v16 = vld [vmem:[%s3693_s16 + $0x60] ss:$16 sps:$4 sm:$0xff]   ;;  %s4088_s25 = smov (!%p362_p12, %s3495_s25), 1 }
  0xaf   : > { %2022 = vmatpush1.bf16.msra.mxu1 %v2869_v9  ;;  %1982 = vmatprep.subr.bf16.mxu0 %v2870_v10  ;;  %v2878_v15 = vld [vmem:[%s3693_s16 + $0x264] ss:$16 sps:$4 sm:$0xff]   ;;  %v2881_v17 = vld [vmem:[%s3693_s16 + $0x260] ss:$16 sps:$4 sm:$0xff]   ;;  %s2518_s20 = sshll.u32 %s4088_s25, 3 }
  0xb0   : > { %2023 = vmatprep.subr.bf16.mxu1 %v2872_v11  ;;  %v2882_v18 = vld [vmem:[%s3693_s16 + $0x84] ss:$16 sps:$4 sm:$0xff]   ;;  %v2886_v20 = vld [vmem:[%s3693_s16 + $0x80] ss:$16 sps:$4 sm:$0xff]   ;;  %s365_s21 = scalar_lea.vmem %s4049_s6, %s2518_s20 }
  0xb1   : > { %v2884_v19 = vld [vmem:[%s3693_s16 + $0x284] ss:$16 sps:$4 sm:$0xff]   ;;  %v2887_v21 = vld [vmem:[%s3693_s16 + $0x280] ss:$16 sps:$4 sm:$0xff]  }
  0xb2   : > { %1983 = vmatpush1.bf16.msra.mxu0 %v2874_v12  ;;  %v2888_v22 = vld [vmem:[%s3693_s16 + $0xa4] ss:$16 sps:$4 sm:$0xff]   ;;  %v2892_v24 = vld [vmem:[%s3693_s16 + $0xa0] ss:$16 sps:$4 sm:$0xff]   ;;  %v372_v12 = vld [vmem:[#allocation2 + $0x28] sm:$0xff] }
  0xb3   : > { %2024 = vmatpush1.bf16.msra.mxu1 %v2875_v13  ;;  %1984 = vmatprep.subr.bf16.mxu0 %v2876_v14  ;;  %v2890_v23 = vld [vmem:[%s3693_s16 + $0x2a4] ss:$16 sps:$4 sm:$0xff]   ;;  %v2893_v25 = vld [vmem:[%s3693_s16 + $0x2a0] ss:$16 sps:$4 sm:$0xff]   ;;  %v380_v13 = vld [vmem:[#allocation4 + $0x28] sm:$0xff] }
  0xb4   : > { %2025 = vmatprep.subr.bf16.mxu1 %v2878_v15  ;;  %v2894_v26 = vld [vmem:[%s3693_s16 + $0xc4] ss:$16 sps:$4 sm:$0xff]   ;;  %v2898_v28 = vld [vmem:[%s3693_s16 + $0xc0] ss:$16 sps:$4 sm:$0xff]   ;;  %v374_v14 = vld [vmem:[#allocation2 + $0x38] sm:$0xff] }
  0xb5   : > { %v2896_v27 = vld [vmem:[%s3693_s16 + $0x2c4] ss:$16 sps:$4 sm:$0xff]   ;;  %v2899_v29 = vld [vmem:[%s3693_s16 + $0x2c0] ss:$16 sps:$4 sm:$0xff]   ;;  %v382_v15 = vld [vmem:[#allocation4 + $0x38] sm:$0xff] }
  0xb6   : > { %1985 = vmatpush1.bf16.msra.mxu0 %v2880_v16  ;;  %v2900_v30 = vld [vmem:[%s3693_s16 + $0xe4] ss:$16 sps:$4 sm:$0xff]   ;;  %v2904_v32 = vld [vmem:[%s3693_s16 + $0xe0] ss:$16 sps:$4 sm:$0xff]   ;;  %v384_v16 = vsub.f32 %v376_v5, %v368_v4 }
  0xb7   : > { %2026 = vmatpush1.bf16.msra.mxu1 %v2881_v17  ;;  %1986 = vmatprep.subr.bf16.mxu0 %v2882_v18  ;;  %v2902_v31 = vld [vmem:[%s3693_s16 + $0x2e4] ss:$16 sps:$4 sm:$0xff]   ;;  %v2905_v33 = vld [vmem:[%s3693_s16 + $0x2e0] ss:$16 sps:$4 sm:$0xff]   ;;  %v386_v17 = vsub.f32 %v378_v7, %v370_v6 }
  0xb8   : > { %2027 = vmatprep.subr.bf16.mxu1 %v2884_v19  ;;  %v2906_v34 = vld [vmem:[%s3693_s16 + $0x104] ss:$16 sps:$4 sm:$0xff]   ;;  %v2910_v36 = vld [vmem:[%s3693_s16 + $0x100] ss:$16 sps:$4 sm:$0xff]  }
  0xb9   : > { %v2908_v35 = vld [vmem:[%s3693_s16 + $0x304] ss:$16 sps:$4 sm:$0xff]   ;;  %v2911_v37 = vld [vmem:[%s3693_s16 + $0x300] ss:$16 sps:$4 sm:$0xff]  }
  0xba   : > { %1987 = vmatpush1.bf16.msra.mxu0 %v2886_v20  ;;  %v2912_v38 = vld [vmem:[%s3693_s16 + $0x124] ss:$16 sps:$4 sm:$0xff]   ;;  %v2916_v40 = vld [vmem:[%s3693_s16 + $0x120] ss:$16 sps:$4 sm:$0xff]   ;;  %v388_v20 = vsub.f32 %v380_v13, %v372_v12 }
  0xbb   : > { %2028 = vmatpush1.bf16.msra.mxu1 %v2887_v21  ;;  %1988 = vmatprep.subr.bf16.mxu0 %v2888_v22  ;;  %v2914_v39 = vld [vmem:[%s3693_s16 + $0x324] ss:$16 sps:$4 sm:$0xff]   ;;  %v2917_v41 = vld [vmem:[%s3693_s16 + $0x320] ss:$16 sps:$4 sm:$0xff]   ;;  %v390_v21 = vsub.f32 %v382_v15, %v374_v14 }
  0xbc   : > { %2029 = vmatprep.subr.bf16.mxu1 %v2890_v23  ;;  %v2918_v42 = vld [vmem:[%s3693_s16 + $0x144] ss:$16 sps:$4 sm:$0xff]   ;;  %v2922_v44 = vld [vmem:[%s3693_s16 + $0x140] ss:$16 sps:$4 sm:$0xff]  }
  0xbd   : > { %v2920_v43 = vld [vmem:[%s3693_s16 + $0x344] ss:$16 sps:$4 sm:$0xff]   ;;  %v2923_v45 = vld [vmem:[%s3693_s16 + $0x340] ss:$16 sps:$4 sm:$0xff]  }
  0xbe   : > { %1989 = vmatpush1.bf16.msra.mxu0 %v2892_v24  ;;  %v2924_v46 = vld [vmem:[%s3693_s16 + $0x164] ss:$16 sps:$4 sm:$0xff]   ;;  %v2928_v48 = vld [vmem:[%s3693_s16 + $0x160] ss:$16 sps:$4 sm:$0xff]  }
  0xbf   : > { %2030 = vmatpush1.bf16.msra.mxu1 %v2893_v25  ;;  %1990 = vmatprep.subr.bf16.mxu0 %v2894_v26  ;;  %v2926_v47 = vld [vmem:[%s3693_s16 + $0x364] ss:$16 sps:$4 sm:$0xff]   ;;  %v2929_v49 = vld [vmem:[%s3693_s16 + $0x360] ss:$16 sps:$4 sm:$0xff]  }
  0xc0   : > { %2031 = vmatprep.subr.bf16.mxu1 %v2896_v27  ;;  %v2930_v50 = vld [vmem:[%s3693_s16 + $0x184] ss:$16 sps:$4 sm:$0xff]   ;;  %v2934_v52 = vld [vmem:[%s3693_s16 + $0x180] ss:$16 sps:$4 sm:$0xff]  }
  0xc1   : > { %v2932_v51 = vld [vmem:[%s3693_s16 + $0x384] ss:$16 sps:$4 sm:$0xff]   ;;  %v2935_v53 = vld [vmem:[%s3693_s16 + $0x380] ss:$16 sps:$4 sm:$0xff]  }
  0xc2   : > { %1991 = vmatpush1.bf16.msra.mxu0 %v2898_v28  ;;  %v2936_v54 = vld [vmem:[%s3693_s16 + $0x1a4] ss:$16 sps:$4 sm:$0xff]   ;;  %v2940_v56 = vld [vmem:[%s3693_s16 + $0x1a0] ss:$16 sps:$4 sm:$0xff]  }
  0xc3   : > { %2032 = vmatpush1.bf16.msra.mxu1 %v2899_v29  ;;  %1992 = vmatprep.subr.bf16.mxu0 %v2900_v30  ;;  %v2938_v55 = vld [vmem:[%s3693_s16 + $0x3a4] ss:$16 sps:$4 sm:$0xff]   ;;  %v2941_v57 = vld [vmem:[%s3693_s16 + $0x3a0] ss:$16 sps:$4 sm:$0xff]  }
  0xc4   : > { %2033 = vmatprep.subr.bf16.mxu1 %v2902_v31  ;;  %v2942_v58 = vld [vmem:[%s3693_s16 + $0x1c4] ss:$16 sps:$4 sm:$0xff]   ;;  %v2946_v60 = vld [vmem:[%s3693_s16 + $0x1c0] ss:$16 sps:$4 sm:$0xff]  }
  0xc5   : > { %v2944_v59 = vld [vmem:[%s3693_s16 + $0x3c4] ss:$16 sps:$4 sm:$0xff]   ;;  %v2947_v61 = vld [vmem:[%s3693_s16 + $0x3c0] ss:$16 sps:$4 sm:$0xff]  }
  0xc6   : > { %1993 = vmatpush1.bf16.msra.mxu0 %v2904_v32  ;;  %v2948_v62 = vld [vmem:[%s3693_s16 + $0x1e4] ss:$16 sps:$4 sm:$0xff]   ;;  %v2952_v0 = vld [vmem:[%s3693_s16 + $0x1e0] ss:$16 sps:$4 sm:$0xff]  }
  0xc7   : > { %2034 = vmatpush1.bf16.msra.mxu1 %v2905_v33  ;;  %1994 = vmatprep.subr.bf16.mxu0 %v2906_v34  ;;  %v2950_v63 = vld [vmem:[%s3693_s16 + $0x3e4] ss:$16 sps:$4 sm:$0xff]   ;;  %v2953_v1 = vld [vmem:[%s3693_s16 + $0x3e0] ss:$16 sps:$4 sm:$0xff]  }
  0xc8   : > { %2035 = vmatprep.subr.bf16.mxu1 %v2908_v35  ;;  %v2956_v2 = vld [vmem:[%s3693_s16 + $0x404] ss:$16 sps:$4 sm:$0xff]   ;;  %v2954_v33 = vld [vmem:[%s3693_s16 + $0x400] ss:$16 sps:$4 sm:$0xff]  }
  0xc9   : > { %v2959_v3 = vld [vmem:[%s3693_s16 + $0x604] ss:$16 sps:$4 sm:$0xff]   ;;  %v2996_v5 = vld [vmem:[%s3693_s16 + $0x4e0] ss:$16 sps:$4 sm:$0xff]  }
  0xca   : > { %1995 = vmatpush1.bf16.msra.mxu0 %v2910_v36  ;;  %v367_v8 = vld [vmem:[#allocation2] sm:$0xff]  ;;  %v369_v10 = vld [vmem:[#allocation2 + $0x10] sm:$0xff] }
  0xcb   : > { %2036 = vmatpush1.bf16.msra.mxu1 %v2911_v37  ;;  %1996 = vmatprep.subr.bf16.mxu0 %v2912_v38  ;;  %v375_v9 = vld [vmem:[#allocation4] sm:$0xff]  ;;  %v377_v11 = vld [vmem:[#allocation4 + $0x10] sm:$0xff] }
  0xcc   : > { %2037 = vmatprep.subr.bf16.mxu1 %v2914_v39  ;;  %v383_v18 = vsub.f32 %v375_v9, %v367_v8  ;;  %v385_v19 = vsub.f32 %v377_v11, %v369_v10  ;;  %v2957_v38 = vld [vmem:[%s3693_s16 + $0x600] ss:$16 sps:$4 sm:$0xff]   ;;  %v3004_v7 = vld [vmem:[%s3693_s16 + $0x504] ss:$16 sps:$4 sm:$0xff]  }
  0xcd   : > { %v3002_v9 = vld [vmem:[%s3693_s16 + $0x500] ss:$16 sps:$4 sm:$0xff]   ;;  %v3010_v11 = vld [vmem:[%s3693_s16 + $0x524] ss:$16 sps:$4 sm:$0xff]  }
  0xce   : > { %1997 = vmatpush1.bf16.msra.mxu0 %v2916_v40  ;;  %v3008_v13 = vld [vmem:[%s3693_s16 + $0x520] ss:$16 sps:$4 sm:$0xff]   ;;  %v3016_v15 = vld [vmem:[%s3693_s16 + $0x544] ss:$16 sps:$4 sm:$0xff]  }
  0xcf   : > { %2038 = vmatpush1.bf16.msra.mxu1 %v2917_v41  ;;  %1998 = vmatprep.subr.bf16.mxu0 %v2918_v42  ;;  %v2962_v41 = vld [vmem:[%s3693_s16 + $0x424] ss:$16 sps:$4 sm:$0xff]   ;;  %v2960_v42 = vld [vmem:[%s3693_s16 + $0x420] ss:$16 sps:$4 sm:$0xff]  }
  0xd0   : > { %2039 = vmatprep.subr.bf16.mxu1 %v2920_v43  ;;  %v2963_v43 = vld [vmem:[%s3693_s16 + $0x620] ss:$16 sps:$4 sm:$0xff]  }
  0xd2   : > { %1999 = vmatpush1.bf16.msra.mxu0 %v2922_v44  ;;  %v2965_v44 = vld [vmem:[%s3693_s16 + $0x624] ss:$16 sps:$4 sm:$0xff]  }
  0xd3   : > { %2040 = vmatpush1.bf16.msra.mxu1 %v2923_v45  ;;  %2000 = vmatprep.subr.bf16.mxu0 %v2924_v46 }
  0xd4   : > { %2041 = vmatprep.subr.bf16.mxu1 %v2926_v47  ;;  %v2968_v47 = vld [vmem:[%s3693_s16 + $0x444] ss:$16 sps:$4 sm:$0xff]  }
  0xd6   : > { %2001 = vmatpush1.bf16.msra.mxu0 %v2928_v48  ;;  %v2971_v48 = vld [vmem:[%s3693_s16 + $0x644] ss:$16 sps:$4 sm:$0xff]  }
  0xd7   : > { %2042 = vmatpush1.bf16.msra.mxu1 %v2929_v49  ;;  %2002 = vmatprep.subr.bf16.mxu0 %v2930_v50  ;;  %v2966_v49 = vld [vmem:[%s3693_s16 + $0x440] ss:$16 sps:$4 sm:$0xff]  }
  0xd8   : > { %2043 = vmatprep.subr.bf16.mxu1 %v2932_v51  ;;  %v2969_v50 = vld [vmem:[%s3693_s16 + $0x640] ss:$16 sps:$4 sm:$0xff]   ;;  %v2974_v51 = vld [vmem:[%s3693_s16 + $0x464] ss:$16 sps:$4 sm:$0xff]  }
  0xda   : > { %2003 = vmatpush1.bf16.msra.mxu0 %v2934_v52  ;;  %v2977_v52 = vld [vmem:[%s3693_s16 + $0x664] ss:$16 sps:$4 sm:$0xff]  }
  0xdb   : > { %2044 = vmatpush1.bf16.msra.mxu1 %v2935_v53  ;;  %2004 = vmatprep.subr.bf16.mxu0 %v2936_v54  ;;  %v2972_v53 = vld [vmem:[%s3693_s16 + $0x460] ss:$16 sps:$4 sm:$0xff]  }
  0xdc   : > { %2045 = vmatprep.subr.bf16.mxu1 %v2938_v55  ;;  %v2975_v54 = vld [vmem:[%s3693_s16 + $0x660] ss:$16 sps:$4 sm:$0xff]   ;;  %v2980_v55 = vld [vmem:[%s3693_s16 + $0x484] ss:$16 sps:$4 sm:$0xff]  }
  0xde   : > { %2005 = vmatpush1.bf16.msra.mxu0 %v2940_v56  ;;  %v2983_v56 = vld [vmem:[%s3693_s16 + $0x684] ss:$16 sps:$4 sm:$0xff]  }
  0xdf   : > { %2046 = vmatpush1.bf16.msra.mxu1 %v2941_v57  ;;  %2006 = vmatprep.subr.bf16.mxu0 %v2942_v58  ;;  %v2978_v57 = vld [vmem:[%s3693_s16 + $0x480] ss:$16 sps:$4 sm:$0xff]  }
  0xe0   : > { %2047 = vmatprep.subr.bf16.mxu1 %v2944_v59  ;;  %v2981_v58 = vld [vmem:[%s3693_s16 + $0x680] ss:$16 sps:$4 sm:$0xff]   ;;  %v2986_v59 = vld [vmem:[%s3693_s16 + $0x4a4] ss:$16 sps:$4 sm:$0xff]  }
  0xe2   : > { %2007 = vmatpush1.bf16.msra.mxu0 %v2946_v60  ;;  %v2989_v60 = vld [vmem:[%s3693_s16 + $0x6a4] ss:$16 sps:$4 sm:$0xff]  }
  0xe3   : > { %2048 = vmatpush1.bf16.msra.mxu1 %v2947_v61  ;;  %2008 = vmatprep.subr.bf16.mxu0 %v2948_v62  ;;  %v2984_v61 = vld [vmem:[%s3693_s16 + $0x4a0] ss:$16 sps:$4 sm:$0xff]  }
  0xe4   : > { %2049 = vmatprep.subr.bf16.mxu1 %v2950_v63  ;;  %v2987_v62 = vld [vmem:[%s3693_s16 + $0x6a0] ss:$16 sps:$4 sm:$0xff]   ;;  %v2992_v63 = vld [vmem:[%s3693_s16 + $0x4c4] ss:$16 sps:$4 sm:$0xff]  }
  0xe6   : > { %2009 = vmatpush1.bf16.msra.mxu0 %v2952_v0  ;;  %v2995_v0 = vld [vmem:[%s3693_s16 + $0x6c4] ss:$16 sps:$4 sm:$0xff]  }
  0xe7   : > { %2050 = vmatpush1.bf16.msra.mxu1 %v2953_v1  ;;  %2060 = vmatprep.subr.bf16.mxu0 %v2956_v2  ;;  %v2990_v1 = vld [vmem:[%s3693_s16 + $0x4c0] ss:$16 sps:$4 sm:$0xff]  }
  0xe8   : > { %2101 = vmatprep.subr.bf16.mxu1 %v2959_v3  ;;  %v2993_v2 = vld [vmem:[%s3693_s16 + $0x6c0] ss:$16 sps:$4 sm:$0xff]   ;;  %v2998_v3 = vld [vmem:[%s3693_s16 + $0x4e4] ss:$16 sps:$4 sm:$0xff]  }
 0x128   : > { %v3768_v22 = vpop.permute.xlu0 %393 }
 0x129   : > { %v397_v23 = vmul.f32 %v3768_v22, %v384_v16  ;;  %v399_v24 = vmul.f32 %v3768_v22, %v386_v17  ;;  %v396_v25 = vmul.f32 %v3768_v22, %v383_v18  ;;  %v398_v26 = vmul.f32 %v3768_v22, %v385_v19  ;;  %v3019_v16 = vld [vmem:[%s3693_s16 + $0x744] ss:$16 sps:$4 sm:$0xff]   ;;  %v3014_v17 = vld [vmem:[%s3693_s16 + $0x540] ss:$16 sps:$4 sm:$0xff]  }
 0x12a   : > { %v401_v27 = vmul.f32 %v3768_v22, %v388_v20  ;;  %v403_v28 = vmul.f32 %v3768_v22, %v390_v21  ;;  %v3017_v18 = vld [vmem:[%s3693_s16 + $0x740] ss:$16 sps:$4 sm:$0xff]   ;;  %v3022_v19 = vld [vmem:[%s3693_s16 + $0x564] ss:$16 sps:$4 sm:$0xff]  }
 0x12b   : > { %v405_v29 = vadd.f32 %v397_v23, %v368_v4  ;;  %v407_v30 = vadd.f32 %v399_v24, %v370_v6  ;;  %v404_v31 = vadd.f32 %v396_v25, %v367_v8  ;;  %v406_v32 = vadd.f32 %v398_v26, %v369_v10  ;;  %v3001_v4 = vld [vmem:[%s3693_s16 + $0x6e4] ss:$16 sps:$4 sm:$0xff]   ;;  %v2999_v6 = vld [vmem:[%s3693_s16 + $0x6e0] ss:$16 sps:$4 sm:$0xff]  }
 0x12c   : > { %v409_v34 = vadd.f32 %v401_v27, %v372_v12  ;;  %v411_v35 = vadd.f32 %v403_v28, %v374_v14  ;;  %v3007_v8 = vld [vmem:[%s3693_s16 + $0x704] ss:$16 sps:$4 sm:$0xff]   ;;  %v3005_v10 = vld [vmem:[%s3693_s16 + $0x700] ss:$16 sps:$4 sm:$0xff]  }
 0x12d   : > { %v3777_v36 = vpack.c.bf16 %v405_v29, %v405_v29  ;;  %v3779_v37 = vpack.c.bf16 %v407_v30, %v407_v30  ;;  %v3782_v39 = vpack.c.bf16 %v404_v31, %v404_v31  ;;  %v3784_v40 = vpack.c.bf16 %v406_v32, %v406_v32  ;;  %v3013_v12 = vld [vmem:[%s3693_s16 + $0x724] ss:$16 sps:$4 sm:$0xff]   ;;  %v3011_v14 = vld [vmem:[%s3693_s16 + $0x720] ss:$16 sps:$4 sm:$0xff]  }
 0x12e   : > { %v3794_v45 = vpack.c.bf16 %v409_v34, %v409_v34  ;;  %v3796_v46 = vpack.c.bf16 %v411_v35, %v411_v35  ;;  %v3025_v20 = vld [vmem:[%s3693_s16 + $0x764] ss:$16 sps:$4 sm:$0xff]   ;;  %v3020_v21 = vld [vmem:[%s3693_s16 + $0x560] ss:$16 sps:$4 sm:$0xff]  }
 0x12f   : > { %2010 = vmatprep.mubr.bf16.mxu0 %v3777_v36  ;;  %2051 = vmatprep.mubr.bf16.mxu1 %v3779_v37  ;;  %v3023_v23 = vld [vmem:[%s3693_s16 + $0x760] ss:$16 sps:$4 sm:$0xff]   ;;  %v3028_v24 = vld [vmem:[%s3693_s16 + $0x584] ss:$16 sps:$4 sm:$0xff]  }
 0x130   : > { %2011 = vmatmul.mubr.bf16.vlgmr.msra.gmra.mrb[0].mxu0 %v3782_v39  ;;  %2052 = vmatmul.mubr.bf16.vlgmr.msra.gmra.mrb[0].mxu1 %v3784_v40  ;;  %v3031_v25 = vld [vmem:[%s3693_s16 + $0x784] ss:$16 sps:$4 sm:$0xff]   ;;  %v3026_v26 = vld [vmem:[%s3693_s16 + $0x580] ss:$16 sps:$4 sm:$0xff]  }
 0x131   : > { %2061 = vmatpush1.bf16.msra.mxu0 %v2954_v33  ;;  %2102 = vmatpush1.bf16.msra.mxu1 %v2957_v38  ;;  %v3029_v27 = vld [vmem:[%s3693_s16 + $0x780] ss:$16 sps:$4 sm:$0xff]   ;;  %v3034_v28 = vld [vmem:[%s3693_s16 + $0x5a4] ss:$16 sps:$4 sm:$0xff]  }
 0x132   : > { %2092 = vmatprep.mubr.bf16.mxu0 %v3794_v45  ;;  %2133 = vmatprep.mubr.bf16.mxu1 %v3796_v46  ;;  %v3037_v29 = vld [vmem:[%s3693_s16 + $0x7a4] ss:$16 sps:$4 sm:$0xff]   ;;  %v3032_v34 = vld [vmem:[%s3693_s16 + $0x5a0] ss:$16 sps:$4 sm:$0xff]  }
 0x133   : > { %2062 = vmatprep.subr.bf16.mxu0 %v2962_v41  ;;  %2103 = vmatprep.subr.bf16.mxu1 %v2965_v44  ;;  %v371_v30 = vld [vmem:[#allocation2 + $0x20] sm:$0xff]  ;;  %v373_v32 = vld [vmem:[#allocation2 + $0x30] sm:$0xff] }
 0x134   : > { %v379_v31 = vld [vmem:[#allocation4 + $0x20] sm:$0xff]  ;;  %v381_v33 = vld [vmem:[#allocation4 + $0x30] sm:$0xff] }
 0x135   : > { %2063 = vmatpush1.bf16.msra.mxu0 %v2960_v42  ;;  %2104 = vmatpush1.bf16.msra.mxu1 %v2963_v43  ;;  %v3035_v35 = vld [vmem:[%s3693_s16 + $0x7a0] ss:$16 sps:$4 sm:$0xff]   ;;  %v3040_v38 = vld [vmem:[%s3693_s16 + $0x5c4] ss:$16 sps:$4 sm:$0xff]   ;;  %v387_v42 = vsub.f32 %v379_v31, %v371_v30  ;;  %v389_v43 = vsub.f32 %v381_v33, %v373_v32  ;;  %v3104_v31 = vld [vmem:[%s3693_s16 + $0x128] ss:$16 sps:$4 sm:$0xff]  }
 0x136   : > { %2064 = vmatprep.subr.bf16.mxu0 %v2968_v47  ;;  %2105 = vmatprep.subr.bf16.mxu1 %v2971_v48  ;;  %v3043_v41 = vld [vmem:[%s3693_s16 + $0x7c4] ss:$16 sps:$4 sm:$0xff]   ;;  %v3038_v44 = vld [vmem:[%s3693_s16 + $0x5c0] ss:$16 sps:$4 sm:$0xff]   ;;  %v3112_v33 = vld [vmem:[%s3693_s16 + $0x14c] ss:$16 sps:$4 sm:$0xff]  }
 0x137   : > { %v3041_v47 = vld [vmem:[%s3693_s16 + $0x7c0] ss:$16 sps:$4 sm:$0xff]   ;;  %v3046_v48 = vld [vmem:[%s3693_s16 + $0x5e4] ss:$16 sps:$4 sm:$0xff]  }
 0x139   : > { %2065 = vmatpush1.bf16.msra.mxu0 %v2966_v49  ;;  %2106 = vmatpush1.bf16.msra.mxu1 %v2969_v50  ;;  %v3049_v49 = vld [vmem:[%s3693_s16 + $0x7e4] ss:$16 sps:$4 sm:$0xff]   ;;  %v400_v50 = vmul.f32 %v3768_v22, %v387_v42  ;;  %v3121_v42 = vld [vmem:[%s3693_s16 + $0x36c] ss:$16 sps:$4 sm:$0xff]  }
 0x13a   : > { %2066 = vmatprep.subr.bf16.mxu0 %v2974_v51  ;;  %2107 = vmatprep.subr.bf16.mxu1 %v2977_v52  ;;  %v402_v51 = vmul.f32 %v3768_v22, %v389_v43  ;;  %v3044_v52 = vld [vmem:[%s3693_s16 + $0x5e0] ss:$16 sps:$4 sm:$0xff]   ;;  %v3116_v43 = vld [vmem:[%s3693_s16 + $0x168] ss:$16 sps:$4 sm:$0xff]  }
 0x13d   : > { %2067 = vmatpush1.bf16.msra.mxu0 %v2972_v53  ;;  %2108 = vmatpush1.bf16.msra.mxu1 %v2975_v54  ;;  %v3047_v53 = vld [vmem:[%s3693_s16 + $0x7e0] ss:$16 sps:$4 sm:$0xff]   ;;  %v408_v54 = vadd.f32 %v400_v50, %v371_v30  ;;  %v3109_v30 = vld [vmem:[%s3693_s16 + $0x32c] ss:$16 sps:$4 sm:$0xff]   ;;  %v3125_v50 = vld [vmem:[%s3693_s16 + $0x388] ss:$16 sps:$4 sm:$0xff]  }
 0x13e   : > { %2068 = vmatprep.subr.bf16.mxu0 %v2980_v55  ;;  %2109 = vmatprep.subr.bf16.mxu1 %v2983_v56  ;;  %v410_v55 = vadd.f32 %v402_v51, %v373_v32  ;;  %v3052_v56 = vld [vmem:[%s3693_s16 + $0xc] ss:$16 sps:$4 sm:$0xff]   ;;  %v3107_v32 = vld [vmem:[%s3693_s16 + $0x328] ss:$16 sps:$4 sm:$0xff]  }
 0x13f   : > { %v3130_v51 = vld [vmem:[%s3693_s16 + $0x1ac] ss:$16 sps:$4 sm:$0xff]  }
 0x141   : > { %2069 = vmatpush1.bf16.msra.mxu0 %v2978_v57  ;;  %2110 = vmatpush1.bf16.msra.mxu1 %v2981_v58  ;;  %v3055_v57 = vld [vmem:[%s3693_s16 + $0x20c] ss:$16 sps:$4 sm:$0xff]   ;;  %v3050_v58 = vld [vmem:[%s3693_s16 + $0x8] ss:$16 sps:$4 sm:$0xff]  }
 0x142   : > { %2070 = vmatprep.subr.bf16.mxu0 %v2986_v59  ;;  %2111 = vmatprep.subr.bf16.mxu1 %v2989_v60  ;;  %v3861_v59 = vpack.c.bf16 %v408_v54, %v408_v54  ;;  %v3863_v60 = vpack.c.bf16 %v410_v55, %v410_v55  ;;  %v3131_v54 = vld [vmem:[%s3693_s16 + $0x3a8] ss:$16 sps:$4 sm:$0xff]   ;;  %v3136_v55 = vld [vmem:[%s3693_s16 + $0x1cc] ss:$16 sps:$4 sm:$0xff]  }
 0x145   : > { %2071 = vmatpush1.bf16.msra.mxu0 %v2984_v61  ;;  %2112 = vmatpush1.bf16.msra.mxu1 %v2987_v62  ;;  %v3053_v61 = vld [vmem:[%s3693_s16 + $0x208] ss:$16 sps:$4 sm:$0xff]   ;;  %v3058_v62 = vld [vmem:[%s3693_s16 + $0x2c] ss:$16 sps:$4 sm:$0xff]  }
 0x146   : > { %2072 = vmatprep.subr.bf16.mxu0 %v2992_v63  ;;  %2113 = vmatprep.subr.bf16.mxu1 %v2995_v0  ;;  %v3061_v63 = vld [vmem:[%s3693_s16 + $0x22c] ss:$16 sps:$4 sm:$0xff]   ;;  %v3056_v0 = vld [vmem:[%s3693_s16 + $0x28] ss:$16 sps:$4 sm:$0xff]  }
 0x149   : > { %2073 = vmatpush1.bf16.msra.mxu0 %v2990_v1  ;;  %2114 = vmatpush1.bf16.msra.mxu1 %v2993_v2  ;;  %v3059_v1 = vld [vmem:[%s3693_s16 + $0x228] ss:$16 sps:$4 sm:$0xff]   ;;  %v3064_v2 = vld [vmem:[%s3693_s16 + $0x4c] ss:$16 sps:$4 sm:$0xff]  }
 0x14a   : > { %2074 = vmatprep.subr.bf16.mxu0 %v2998_v3  ;;  %2115 = vmatprep.subr.bf16.mxu1 %v3001_v4  ;;  %v3067_v3 = vld [vmem:[%s3693_s16 + $0x24c] ss:$16 sps:$4 sm:$0xff]   ;;  %v3062_v4 = vld [vmem:[%s3693_s16 + $0x48] ss:$16 sps:$4 sm:$0xff]  }
 0x14d   : > { %2075 = vmatpush1.bf16.msra.mxu0 %v2996_v5  ;;  %2116 = vmatpush1.bf16.msra.mxu1 %v2999_v6  ;;  %v3070_v5 = vld [vmem:[%s3693_s16 + $0x6c] ss:$16 sps:$4 sm:$0xff]  }
 0x14e   : > { %2076 = vmatprep.subr.bf16.mxu0 %v3004_v7  ;;  %2117 = vmatprep.subr.bf16.mxu1 %v3007_v8  ;;  %v3073_v6 = vld [vmem:[%s3693_s16 + $0x26c] ss:$16 sps:$4 sm:$0xff]   ;;  %v3071_v7 = vld [vmem:[%s3693_s16 + $0x268] ss:$16 sps:$4 sm:$0xff]  }
 0x14f   : > { %v3076_v8 = vld [vmem:[%s3693_s16 + $0x8c] ss:$16 sps:$4 sm:$0xff]  }
 0x151   : > { %2077 = vmatpush1.bf16.msra.mxu0 %v3002_v9  ;;  %2118 = vmatpush1.bf16.msra.mxu1 %v3005_v10  ;;  %v3079_v9 = vld [vmem:[%s3693_s16 + $0x28c] ss:$16 sps:$4 sm:$0xff]   ;;  %v3074_v10 = vld [vmem:[%s3693_s16 + $0x88] ss:$16 sps:$4 sm:$0xff]  }
 0x152   : > { %2078 = vmatprep.subr.bf16.mxu0 %v3010_v11  ;;  %2119 = vmatprep.subr.bf16.mxu1 %v3013_v12  ;;  %v3077_v11 = vld [vmem:[%s3693_s16 + $0x288] ss:$16 sps:$4 sm:$0xff]   ;;  %v3082_v12 = vld [vmem:[%s3693_s16 + $0xac] ss:$16 sps:$4 sm:$0xff]  }
 0x155   : > { %2079 = vmatpush1.bf16.msra.mxu0 %v3008_v13  ;;  %2120 = vmatpush1.bf16.msra.mxu1 %v3011_v14  ;;  %v3085_v13 = vld [vmem:[%s3693_s16 + $0x2ac] ss:$16 sps:$4 sm:$0xff]   ;;  %v3080_v14 = vld [vmem:[%s3693_s16 + $0xa8] ss:$16 sps:$4 sm:$0xff]  }
 0x156   : > { %2080 = vmatprep.subr.bf16.mxu0 %v3016_v15  ;;  %2121 = vmatprep.subr.bf16.mxu1 %v3019_v16  ;;  %v3083_v15 = vld [vmem:[%s3693_s16 + $0x2a8] ss:$16 sps:$4 sm:$0xff]   ;;  %v3088_v16 = vld [vmem:[%s3693_s16 + $0xcc] ss:$16 sps:$4 sm:$0xff]  }
 0x159   : > { %2081 = vmatpush1.bf16.msra.mxu0 %v3014_v17  ;;  %2122 = vmatpush1.bf16.msra.mxu1 %v3017_v18  ;;  %v3091_v17 = vld [vmem:[%s3693_s16 + $0x2cc] ss:$16 sps:$4 sm:$0xff]   ;;  %v3086_v18 = vld [vmem:[%s3693_s16 + $0xc8] ss:$16 sps:$4 sm:$0xff]  }
 0x15a   : > { %2082 = vmatprep.subr.bf16.mxu0 %v3022_v19  ;;  %2123 = vmatprep.subr.bf16.mxu1 %v3025_v20  ;;  %v3089_v19 = vld [vmem:[%s3693_s16 + $0x2c8] ss:$16 sps:$4 sm:$0xff]   ;;  %v3094_v20 = vld [vmem:[%s3693_s16 + $0xec] ss:$16 sps:$4 sm:$0xff]  }
 0x15d   : > { %2083 = vmatpush1.bf16.msra.mxu0 %v3020_v21  ;;  %2124 = vmatpush1.bf16.msra.mxu1 %v3023_v23  ;;  %v3097_v21 = vld [vmem:[%s3693_s16 + $0x2ec] ss:$16 sps:$4 sm:$0xff]   ;;  %v3092_v23 = vld [vmem:[%s3693_s16 + $0xe8] ss:$16 sps:$4 sm:$0xff]  }
 0x15e   : > { %2084 = vmatprep.subr.bf16.mxu0 %v3028_v24  ;;  %2125 = vmatprep.subr.bf16.mxu1 %v3031_v25  ;;  %v3095_v24 = vld [vmem:[%s3693_s16 + $0x2e8] ss:$16 sps:$4 sm:$0xff]   ;;  %v3100_v25 = vld [vmem:[%s3693_s16 + $0x10c] ss:$16 sps:$4 sm:$0xff]  }
 0x161   : > { %2085 = vmatpush1.bf16.msra.mxu0 %v3026_v26  ;;  %2126 = vmatpush1.bf16.msra.mxu1 %v3029_v27  ;;  %v3103_v26 = vld [vmem:[%s3693_s16 + $0x30c] ss:$16 sps:$4 sm:$0xff]   ;;  %v3098_v27 = vld [vmem:[%s3693_s16 + $0x108] ss:$16 sps:$4 sm:$0xff]  }
 0x162   : > { %2086 = vmatprep.subr.bf16.mxu0 %v3034_v28  ;;  %2127 = vmatprep.subr.bf16.mxu1 %v3037_v29  ;;  %v3101_v28 = vld [vmem:[%s3693_s16 + $0x308] ss:$16 sps:$4 sm:$0xff]   ;;  %v3106_v29 = vld [vmem:[%s3693_s16 + $0x12c] ss:$16 sps:$4 sm:$0xff]  }
 0x165   : > { %2087 = vmatpush1.bf16.msra.mxu0 %v3032_v34  ;;  %2128 = vmatpush1.bf16.msra.mxu1 %v3035_v35  ;;  %v3115_v34 = vld [vmem:[%s3693_s16 + $0x34c] ss:$16 sps:$4 sm:$0xff]   ;;  %v3110_v35 = vld [vmem:[%s3693_s16 + $0x148] ss:$16 sps:$4 sm:$0xff]  }
 0x166   : > { %2088 = vmatprep.subr.bf16.mxu0 %v3040_v38  ;;  %2129 = vmatprep.subr.bf16.mxu1 %v3043_v41  ;;  %v3113_v38 = vld [vmem:[%s3693_s16 + $0x348] ss:$16 sps:$4 sm:$0xff]   ;;  %v3118_v41 = vld [vmem:[%s3693_s16 + $0x16c] ss:$16 sps:$4 sm:$0xff]  }
 0x169   : > { %2089 = vmatpush1.bf16.msra.mxu0 %v3038_v44  ;;  %2130 = vmatpush1.bf16.msra.mxu1 %v3041_v47  ;;  %v3119_v44 = vld [vmem:[%s3693_s16 + $0x368] ss:$16 sps:$4 sm:$0xff]   ;;  %v3124_v47 = vld [vmem:[%s3693_s16 + $0x18c] ss:$16 sps:$4 sm:$0xff]  }
 0x16a   : > { %2090 = vmatprep.subr.bf16.mxu0 %v3046_v48  ;;  %2131 = vmatprep.subr.bf16.mxu1 %v3049_v49  ;;  %v3127_v48 = vld [vmem:[%s3693_s16 + $0x38c] ss:$16 sps:$4 sm:$0xff]   ;;  %v3122_v49 = vld [vmem:[%s3693_s16 + $0x188] ss:$16 sps:$4 sm:$0xff]  }
 0x16d   : > { %2091 = vmatpush1.bf16.msra.mxu0 %v3044_v52  ;;  %2132 = vmatpush1.bf16.msra.mxu1 %v3047_v53  ;;  %v3133_v52 = vld [vmem:[%s3693_s16 + $0x3ac] ss:$16 sps:$4 sm:$0xff]   ;;  %v3128_v53 = vld [vmem:[%s3693_s16 + $0x1a8] ss:$16 sps:$4 sm:$0xff]  }
 0x16e   : > { %2142 = vmatprep.subr.bf16.mxu0 %v3052_v56  ;;  %2183 = vmatprep.subr.bf16.mxu1 %v3055_v57  ;;  %v3139_v56 = vld [vmem:[%s3693_s16 + $0x3cc] ss:$16 sps:$4 sm:$0xff]   ;;  %v3134_v57 = vld [vmem:[%s3693_s16 + $0x1c8] ss:$16 sps:$4 sm:$0xff]  }
 0x170   : > { %2093 = vmatmul.mubr.bf16.vlgmr.msra.gmra.mrb[4].mxu0 %v3861_v59  ;;  %2134 = vmatmul.mubr.bf16.vlgmr.msra.gmra.mrb[4].mxu1 %v3863_v60 }
 0x171   : > { %2143 = vmatpush1.bf16.msra.mxu0 %v3050_v58  ;;  %2174 = vmatprep.mubr.bf16.mxu0 %v3777_v36  ;;  %v3065_v36 = vld [vmem:[%s3693_s16 + $0x248] ss:$16 sps:$4 sm:$0xff]  }
 0x172   : > { %2184 = vmatpush1.bf16.msra.mxu1 %v3053_v61  ;;  %2215 = vmatprep.mubr.bf16.mxu1 %v3779_v37  ;;  %v3068_v37 = vld [vmem:[%s3693_s16 + $0x68] ss:$16 sps:$4 sm:$0xff]   ;;  %v3142_v61 = vld [vmem:[%s3693_s16 + $0x1ec] ss:$16 sps:$4 sm:$0xff]  }
 0x173   : > { %2144 = vmatprep.subr.bf16.mxu0 %v3058_v62  ;;  %2185 = vmatprep.subr.bf16.mxu1 %v3061_v63  ;;  %v3137_v58 = vld [vmem:[%s3693_s16 + $0x3c8] ss:$16 sps:$4 sm:$0xff]   ;;  %v3145_v62 = vld [vmem:[%s3693_s16 + $0x3ec] ss:$16 sps:$4 sm:$0xff]  }
 0x174   : > { %v3140_v63 = vld [vmem:[%s3693_s16 + $0x1e8] ss:$16 sps:$4 sm:$0xff]  }
 0x175   : > { %2145 = vmatpush1.bf16.msra.mxu0 %v3056_v0  ;;  %v3143_v0 = vld [vmem:[%s3693_s16 + $0x3e8] ss:$16 sps:$4 sm:$0xff]  }
 0x176   : > { %2186 = vmatpush1.bf16.msra.mxu1 %v3059_v1  ;;  %2146 = vmatprep.subr.bf16.mxu0 %v3064_v2  ;;  %v3148_v1 = vld [vmem:[%s3693_s16 + $0x40c] ss:$16 sps:$4 sm:$0xff]  }
 0x177   : > { %2187 = vmatprep.subr.bf16.mxu1 %v3067_v3  ;;  %v3151_v2 = vld [vmem:[%s3693_s16 + $0x60c] ss:$16 sps:$4 sm:$0xff]   ;;  %v3146_v3 = vld [vmem:[%s3693_s16 + $0x408] ss:$16 sps:$4 sm:$0xff]  }
 0x179   : > { %2147 = vmatpush1.bf16.msra.mxu0 %v3062_v4  ;;  %v3149_v4 = vld [vmem:[%s3693_s16 + $0x608] ss:$16 sps:$4 sm:$0xff]  }
 0x17a   : > { %2188 = vmatpush1.bf16.msra.mxu1 %v3065_v36  ;;  %2148 = vmatprep.subr.bf16.mxu0 %v3070_v5  ;;  %v3154_v36 = vld [vmem:[%s3693_s16 + $0x42c] ss:$16 sps:$4 sm:$0xff]  }
 0x17b   : > { %2189 = vmatprep.subr.bf16.mxu1 %v3073_v6  ;;  %v3157_v5 = vld [vmem:[%s3693_s16 + $0x62c] ss:$16 sps:$4 sm:$0xff]   ;;  %v3152_v6 = vld [vmem:[%s3693_s16 + $0x428] ss:$16 sps:$4 sm:$0xff]  }
 0x17d   : > { %2149 = vmatpush1.bf16.msra.mxu0 %v3068_v37  ;;  %v3155_v37 = vld [vmem:[%s3693_s16 + $0x628] ss:$16 sps:$4 sm:$0xff]  }
 0x17e   : > { %2190 = vmatpush1.bf16.msra.mxu1 %v3071_v7  ;;  %2150 = vmatprep.subr.bf16.mxu0 %v3076_v8  ;;  %v3160_v7 = vld [vmem:[%s3693_s16 + $0x44c] ss:$16 sps:$4 sm:$0xff]   ;;  %v3161_v8 = vld [vmem:[%s3693_s16 + $0x648] ss:$16 sps:$4 sm:$0xff]  }
 0x17f   : > { %2191 = vmatprep.subr.bf16.mxu1 %v3079_v9  ;;  %v3169_v9 = vld [vmem:[%s3693_s16 + $0x66c] ss:$16 sps:$4 sm:$0xff]  }
 0x181   : > { %2151 = vmatpush1.bf16.msra.mxu0 %v3074_v10  ;;  %v3167_v10 = vld [vmem:[%s3693_s16 + $0x668] ss:$16 sps:$4 sm:$0xff]  }
 0x182   : > { %2192 = vmatpush1.bf16.msra.mxu1 %v3077_v11  ;;  %2152 = vmatprep.subr.bf16.mxu0 %v3082_v12  ;;  %v3172_v11 = vld [vmem:[%s3693_s16 + $0x48c] ss:$16 sps:$4 sm:$0xff]  }
 0x183   : > { %2193 = vmatprep.subr.bf16.mxu1 %v3085_v13  ;;  %v3175_v12 = vld [vmem:[%s3693_s16 + $0x68c] ss:$16 sps:$4 sm:$0xff]   ;;  %v3170_v13 = vld [vmem:[%s3693_s16 + $0x488] ss:$16 sps:$4 sm:$0xff]  }
 0x185   : > { %2153 = vmatpush1.bf16.msra.mxu0 %v3080_v14  ;;  %v3173_v14 = vld [vmem:[%s3693_s16 + $0x688] ss:$16 sps:$4 sm:$0xff]  }
 0x186   : > { %2194 = vmatpush1.bf16.msra.mxu1 %v3083_v15  ;;  %2154 = vmatprep.subr.bf16.mxu0 %v3088_v16  ;;  %v3178_v15 = vld [vmem:[%s3693_s16 + $0x4ac] ss:$16 sps:$4 sm:$0xff]  }
 0x187   : > { %2195 = vmatprep.subr.bf16.mxu1 %v3091_v17  ;;  %v3181_v16 = vld [vmem:[%s3693_s16 + $0x6ac] ss:$16 sps:$4 sm:$0xff]   ;;  %v3176_v17 = vld [vmem:[%s3693_s16 + $0x4a8] ss:$16 sps:$4 sm:$0xff]  }
 0x189   : > { %2155 = vmatpush1.bf16.msra.mxu0 %v3086_v18  ;;  %v3179_v18 = vld [vmem:[%s3693_s16 + $0x6a8] ss:$16 sps:$4 sm:$0xff]  }
 0x18a   : > { %2196 = vmatpush1.bf16.msra.mxu1 %v3089_v19  ;;  %2156 = vmatprep.subr.bf16.mxu0 %v3094_v20  ;;  %v3184_v19 = vld [vmem:[%s3693_s16 + $0x4cc] ss:$16 sps:$4 sm:$0xff]  }
 0x18b   : > { %2197 = vmatprep.subr.bf16.mxu1 %v3097_v21  ;;  %v3187_v20 = vld [vmem:[%s3693_s16 + $0x6cc] ss:$16 sps:$4 sm:$0xff]   ;;  %v3182_v21 = vld [vmem:[%s3693_s16 + $0x4c8] ss:$16 sps:$4 sm:$0xff]  }
 0x18d   : > { %2157 = vmatpush1.bf16.msra.mxu0 %v3092_v23  ;;  %v3185_v23 = vld [vmem:[%s3693_s16 + $0x6c8] ss:$16 sps:$4 sm:$0xff]  }
 0x18e   : > { %2198 = vmatpush1.bf16.msra.mxu1 %v3095_v24  ;;  %2158 = vmatprep.subr.bf16.mxu0 %v3100_v25  ;;  %v3190_v24 = vld [vmem:[%s3693_s16 + $0x4ec] ss:$16 sps:$4 sm:$0xff]  }
 0x18f   : > { %2199 = vmatprep.subr.bf16.mxu1 %v3103_v26  ;;  %v3193_v25 = vld [vmem:[%s3693_s16 + $0x6ec] ss:$16 sps:$4 sm:$0xff]   ;;  %v3188_v26 = vld [vmem:[%s3693_s16 + $0x4e8] ss:$16 sps:$4 sm:$0xff]  }
 0x191   : > { %2159 = vmatpush1.bf16.msra.mxu0 %v3098_v27  ;;  %v3191_v27 = vld [vmem:[%s3693_s16 + $0x6e8] ss:$16 sps:$4 sm:$0xff]  }
 0x192   : > { %2200 = vmatpush1.bf16.msra.mxu1 %v3101_v28  ;;  %2160 = vmatprep.subr.bf16.mxu0 %v3106_v29  ;;  %v3196_v28 = vld [vmem:[%s3693_s16 + $0x50c] ss:$16 sps:$4 sm:$0xff]  }
 0x193   : > { %2201 = vmatprep.subr.bf16.mxu1 %v3109_v30  ;;  %v3199_v29 = vld [vmem:[%s3693_s16 + $0x70c] ss:$16 sps:$4 sm:$0xff]   ;;  %v3194_v30 = vld [vmem:[%s3693_s16 + $0x508] ss:$16 sps:$4 sm:$0xff]  }
 0x195   : > { %2161 = vmatpush1.bf16.msra.mxu0 %v3104_v31  ;;  %v3197_v31 = vld [vmem:[%s3693_s16 + $0x708] ss:$16 sps:$4 sm:$0xff]  }
 0x196   : > { %2202 = vmatpush1.bf16.msra.mxu1 %v3107_v32  ;;  %2162 = vmatprep.subr.bf16.mxu0 %v3112_v33  ;;  %v3202_v32 = vld [vmem:[%s3693_s16 + $0x52c] ss:$16 sps:$4 sm:$0xff]  }
 0x197   : > { %2203 = vmatprep.subr.bf16.mxu1 %v3115_v34  ;;  %v3205_v33 = vld [vmem:[%s3693_s16 + $0x72c] ss:$16 sps:$4 sm:$0xff]   ;;  %v3200_v34 = vld [vmem:[%s3693_s16 + $0x528] ss:$16 sps:$4 sm:$0xff]  }
 0x199   : > { %2163 = vmatpush1.bf16.msra.mxu0 %v3110_v35  ;;  %v3203_v35 = vld [vmem:[%s3693_s16 + $0x728] ss:$16 sps:$4 sm:$0xff]  }
 0x19a   : > { %2204 = vmatpush1.bf16.msra.mxu1 %v3113_v38  ;;  %2164 = vmatprep.subr.bf16.mxu0 %v3118_v41  ;;  %v3208_v38 = vld [vmem:[%s3693_s16 + $0x54c] ss:$16 sps:$4 sm:$0xff]  }
 0x19b   : > { %2205 = vmatprep.subr.bf16.mxu1 %v3121_v42  ;;  %v3211_v41 = vld [vmem:[%s3693_s16 + $0x74c] ss:$16 sps:$4 sm:$0xff]   ;;  %v3206_v42 = vld [vmem:[%s3693_s16 + $0x548] ss:$16 sps:$4 sm:$0xff]  }
 0x19d   : > { %2165 = vmatpush1.bf16.msra.mxu0 %v3116_v43  ;;  %v3209_v43 = vld [vmem:[%s3693_s16 + $0x748] ss:$16 sps:$4 sm:$0xff]  }
 0x19e   : > { %2206 = vmatpush1.bf16.msra.mxu1 %v3119_v44  ;;  %2166 = vmatprep.subr.bf16.mxu0 %v3124_v47  ;;  %v3214_v44 = vld [vmem:[%s3693_s16 + $0x56c] ss:$16 sps:$4 sm:$0xff]  }
 0x19f   : > { %2207 = vmatprep.subr.bf16.mxu1 %v3127_v48  ;;  %v3217_v47 = vld [vmem:[%s3693_s16 + $0x76c] ss:$16 sps:$4 sm:$0xff]   ;;  %v3212_v48 = vld [vmem:[%s3693_s16 + $0x568] ss:$16 sps:$4 sm:$0xff]  }
 0x1a1   : > { %2167 = vmatpush1.bf16.msra.mxu0 %v3122_v49  ;;  %v3215_v49 = vld [vmem:[%s3693_s16 + $0x768] ss:$16 sps:$4 sm:$0xff]  }
 0x1a2   : > { %2208 = vmatpush1.bf16.msra.mxu1 %v3125_v50  ;;  %2168 = vmatprep.subr.bf16.mxu0 %v3130_v51  ;;  %v3220_v50 = vld [vmem:[%s3693_s16 + $0x58c] ss:$16 sps:$4 sm:$0xff]  }
 0x1a3   : > { %2209 = vmatprep.subr.bf16.mxu1 %v3133_v52  ;;  %v3223_v51 = vld [vmem:[%s3693_s16 + $0x78c] ss:$16 sps:$4 sm:$0xff]   ;;  %v3218_v52 = vld [vmem:[%s3693_s16 + $0x588] ss:$16 sps:$4 sm:$0xff]  }
 0x1a5   : > { %2169 = vmatpush1.bf16.msra.mxu0 %v3128_v53  ;;  %v3221_v53 = vld [vmem:[%s3693_s16 + $0x788] ss:$16 sps:$4 sm:$0xff]  }
 0x1a6   : > { %2210 = vmatpush1.bf16.msra.mxu1 %v3131_v54  ;;  %2170 = vmatprep.subr.bf16.mxu0 %v3136_v55  ;;  %v3226_v54 = vld [vmem:[%s3693_s16 + $0x5ac] ss:$16 sps:$4 sm:$0xff]  }
 0x1a7   : > { %2211 = vmatprep.subr.bf16.mxu1 %v3139_v56  ;;  %v3229_v55 = vld [vmem:[%s3693_s16 + $0x7ac] ss:$16 sps:$4 sm:$0xff]   ;;  %v3224_v56 = vld [vmem:[%s3693_s16 + $0x5a8] ss:$16 sps:$4 sm:$0xff]  }
 0x1a9   : > { %2171 = vmatpush1.bf16.msra.mxu0 %v3134_v57  ;;  %v3227_v57 = vld [vmem:[%s3693_s16 + $0x7a8] ss:$16 sps:$4 sm:$0xff]  }
 0x1aa   : > { %2212 = vmatpush1.bf16.msra.mxu1 %v3137_v58  ;;  %2172 = vmatprep.subr.bf16.mxu0 %v3142_v61  ;;  %v3232_v58 = vld [vmem:[%s3693_s16 + $0x5cc] ss:$16 sps:$4 sm:$0xff]  }
 0x1ab   : > { %2213 = vmatprep.subr.bf16.mxu1 %v3145_v62  ;;  %v3235_v61 = vld [vmem:[%s3693_s16 + $0x7cc] ss:$16 sps:$4 sm:$0xff]   ;;  %v3230_v62 = vld [vmem:[%s3693_s16 + $0x5c8] ss:$16 sps:$4 sm:$0xff]  }
 0x1ad   : > { %2173 = vmatpush1.bf16.msra.mxu0 %v3140_v63  ;;  %v3233_v63 = vld [vmem:[%s3693_s16 + $0x7c8] ss:$16 sps:$4 sm:$0xff]  }
 0x1ae   : > { %2214 = vmatpush1.bf16.msra.mxu1 %v3143_v0  ;;  %2224 = vmatprep.subr.bf16.mxu0 %v3148_v1  ;;  %v3238_v0 = vld [vmem:[%s3693_s16 + $0x5ec] ss:$16 sps:$4 sm:$0xff]  }
 0x1af   : > { %2265 = vmatprep.subr.bf16.mxu1 %v3151_v2  ;;  %v3241_v1 = vld [vmem:[%s3693_s16 + $0x7ec] ss:$16 sps:$4 sm:$0xff]   ;;  %v3236_v2 = vld [vmem:[%s3693_s16 + $0x5e8] ss:$16 sps:$4 sm:$0xff]  }
 0x1b0   : > { %2175 = vmatmul.mubr.bf16.vlgmr.msra.gmra.mrb[8].mxu0 %v3782_v39  ;;  %v3163_v39 = vld [vmem:[%s3693_s16 + $0x64c] ss:$16 sps:$4 sm:$0xff]  }
 0x1b1   : > { %2216 = vmatmul.mubr.bf16.vlgmr.msra.gmra.mrb[8].mxu1 %v3784_v40  ;;  %2225 = vmatpush1.bf16.msra.mxu0 %v3146_v3  ;;  %v3158_v40 = vld [vmem:[%s3693_s16 + $0x448] ss:$16 sps:$4 sm:$0xff]  }
 0x1b2   : > { %2256 = vmatprep.mubr.bf16.mxu0 %v3794_v45  ;;  %2266 = vmatpush1.bf16.msra.mxu1 %v3149_v4  ;;  %v3166_v45 = vld [vmem:[%s3693_s16 + $0x46c] ss:$16 sps:$4 sm:$0xff]   ;;  %v3239_v3 = vld [vmem:[%s3693_s16 + $0x7e8] ss:$16 sps:$4 sm:$0xff]   ;;  %v678_v4 = vlaneseq }
 0x1b3   : > { %2297 = vmatprep.mubr.bf16.mxu1 %v3796_v46  ;;  %2226 = vmatprep.subr.bf16.mxu0 %v3154_v36  ;;  %v3164_v46 = vld [vmem:[%s3693_s16 + $0x468] ss:$16 sps:$4 sm:$0xff]  }
 0x1b4   : > { %2267 = vmatprep.subr.bf16.mxu1 %v3157_v5  ;;  %v4002_v36 = vshrl.u32 %v678_v4, 7  ;;  %v676_v5 = vld [vmem:[%s312_s17] sm:$0xf] }
 0x1b5   : > { %2227 = vmatpush1.bf16.msra.mxu0 %v3152_v6 }
 0x1b6   : > { %2268 = vmatpush1.bf16.msra.mxu1 %v3155_v37  ;;  %2228 = vmatprep.subr.bf16.mxu0 %v3160_v7  ;;  %v680_v6 = vsub.s32 0, %v4002_v36  ;;  %v684_v37 = vsub.s32 1, %v4002_v36 }
 0x1b7   : > { %2269 = vmatprep.subr.bf16.mxu1 %v3163_v39 }
 0x1b8   : > { %v681_v7 = vrot.slane %v676_v5, %v680_v6  ;;  %v685_v39 = vrot.slane %v676_v5, %v684_v37 }
 0x1b9   : > { %2229 = vmatpush1.bf16.msra.mxu0 %v3158_v40 }
 0x1ba   : > { %2270 = vmatpush1.bf16.msra.mxu1 %v3161_v8  ;;  %2230 = vmatprep.subr.bf16.mxu0 %v3166_v45 }
 0x1bb   : > { %2271 = vmatprep.subr.bf16.mxu1 %v3169_v9 }
 0x1bd   : > { %2231 = vmatpush1.bf16.msra.mxu0 %v3164_v46 }
 0x1be   : > { %2272 = vmatpush1.bf16.msra.mxu1 %v3167_v10  ;;  %2232 = vmatprep.subr.bf16.mxu0 %v3172_v11 }
 0x1bf   : > { %2273 = vmatprep.subr.bf16.mxu1 %v3175_v12 }
 0x1c1   : > { %2233 = vmatpush1.bf16.msra.mxu0 %v3170_v13 }
 0x1c2   : > { %2274 = vmatpush1.bf16.msra.mxu1 %v3173_v14  ;;  %2234 = vmatprep.subr.bf16.mxu0 %v3178_v15  ;;  %v2306_v15 = vld [vmem:[%s321_s14] sm:$0xf] }
 0x1c3   : > { %2275 = vmatprep.subr.bf16.mxu1 %v3181_v16  ;;  %v2311_v16 = vrot.slane %v2306_v15, %v680_v6 }
 0x1c5   : > { %2235 = vmatpush1.bf16.msra.mxu0 %v3176_v17 }
 0x1c6   : > { %2276 = vmatpush1.bf16.msra.mxu1 %v3179_v18  ;;  %2236 = vmatprep.subr.bf16.mxu0 %v3184_v19  ;;  %v2341_v19 = vld [vmem:[%s4007_s12] sm:$0xff] }
 0x1c7   : > { %2277 = vmatprep.subr.bf16.mxu1 %v3187_v20  ;;  %v2347_v20 = vld [vmem:[%s4010_s11] sm:$0xff] }
 0x1c9   : > { %2237 = vmatpush1.bf16.msra.mxu0 %v3182_v21  ;;  %v2315_v21 = vrot.slane %v2306_v15, %v684_v37 }
 0x1ca   : > { %2278 = vmatpush1.bf16.msra.mxu1 %v3185_v23  ;;  %2238 = vmatprep.subr.bf16.mxu0 %v3190_v24 }
 0x1cb   : > { %2279 = vmatprep.subr.bf16.mxu1 %v3193_v25 }
 0x1cd   : > { %2239 = vmatpush1.bf16.msra.mxu0 %v3188_v26  ;;  %v2342_v26 = vld [vmem:[%s4007_s12 + $0x8] sm:$0xff] }
 0x1ce   : > { %2280 = vmatpush1.bf16.msra.mxu1 %v3191_v27  ;;  %2240 = vmatprep.subr.bf16.mxu0 %v3196_v28  ;;  %v2348_v27 = vld [vmem:[%s4010_s11 + $0x8] sm:$0xff] }
 0x1cf   : > { %2281 = vmatprep.subr.bf16.mxu1 %v3199_v29 }
 0x1d1   : > { %2241 = vmatpush1.bf16.msra.mxu0 %v3194_v30 }
 0x1d2   : > { %2282 = vmatpush1.bf16.msra.mxu1 %v3197_v31  ;;  %2242 = vmatprep.subr.bf16.mxu0 %v3202_v32  ;;  %v2328_v32 = vmul.f32 %v2311_v16, %v3768_v22 }
 0x1d3   : > { %2283 = vmatprep.subr.bf16.mxu1 %v3205_v33  ;;  %v2351_v33 = vsub.f32 %v2341_v19, %v2347_v20 }
 0x1d5   : > { %2243 = vmatpush1.bf16.msra.mxu0 %v3200_v34 }
 0x1d6   : > { %2284 = vmatpush1.bf16.msra.mxu1 %v3203_v35  ;;  %2244 = vmatprep.subr.bf16.mxu0 %v3208_v38 }
 0x1d7   : > { %2285 = vmatprep.subr.bf16.mxu1 %v3211_v41  ;;  %v2329_v41 = vmul.f32 %v2315_v21, %v3768_v22 }
 0x1d9   : > { %2245 = vmatpush1.bf16.msra.mxu0 %v3206_v42  ;;  %v2352_v42 = vsub.f32 %v2342_v26, %v2348_v27 }
 0x1da   : > { %2286 = vmatpush1.bf16.msra.mxu1 %v3209_v43  ;;  %2246 = vmatprep.subr.bf16.mxu0 %v3214_v44 }
 0x1db   : > { %2287 = vmatprep.subr.bf16.mxu1 %v3217_v47 }
 0x1dd   : > { %2247 = vmatpush1.bf16.msra.mxu0 %v3212_v48 }
 0x1de   : > { %2288 = vmatpush1.bf16.msra.mxu1 %v3215_v49  ;;  %2248 = vmatprep.subr.bf16.mxu0 %v3220_v50 }
 0x1df   : > { %2289 = vmatprep.subr.bf16.mxu1 %v3223_v51 }
 0x1e1   : > { %2249 = vmatpush1.bf16.msra.mxu0 %v3218_v52  ;;  %v688_v52 = vsub.s32 2, %v4002_v36 }
 0x1e2   : > { %2290 = vmatpush1.bf16.msra.mxu1 %v3221_v53  ;;  %2250 = vmatprep.subr.bf16.mxu0 %v3226_v54  ;;  %v692_v53 = vsub.s32 3, %v4002_v36 }
 0x1e3   : > { %2291 = vmatprep.subr.bf16.mxu1 %v3229_v55  ;;  %v689_v54 = vrot.slane %v676_v5, %v688_v52  ;;  %v2319_v37 = vrot.slane %v2306_v15, %v688_v52 }
 0x1e4   : > { %v693_v55 = vrot.slane %v676_v5, %v692_v53  ;;  %v2323_v5 = vrot.slane %v2306_v15, %v692_v53 }
 0x1e5   : > { %2251 = vmatpush1.bf16.msra.mxu0 %v3224_v56 }
 0x1e6   : > { %2292 = vmatpush1.bf16.msra.mxu1 %v3227_v57  ;;  %2252 = vmatprep.subr.bf16.mxu0 %v3232_v58 }
 0x1e7   : > { %2293 = vmatprep.subr.bf16.mxu1 %v3235_v61 }
 0x1e9   : > { %2253 = vmatpush1.bf16.msra.mxu0 %v3230_v62 }
 0x1ea   : > { %2294 = vmatpush1.bf16.msra.mxu1 %v3233_v63  ;;  %2254 = vmatprep.subr.bf16.mxu0 %v3238_v0 }
 0x1eb   : > { %2295 = vmatprep.subr.bf16.mxu1 %v3241_v1 }
 0x1ed   : > { %2255 = vmatpush1.bf16.msra.mxu0 %v3236_v2 }
 0x1ee   : > { %2296 = vmatpush1.bf16.msra.mxu1 %v3239_v3 }
 0x1f0   : > { %2257 = vmatmul.mubr.bf16.vlgmr.msra.gmra.mrb[12].mxu0 %v3861_v59 }
 0x1f1   : > { %2298 = vmatmul.mubr.bf16.vlgmr.msra.gmra.mrb[12].mxu1 %v3863_v60 }
 0x203   : > { %v2012_v40 = vpop.f32.mrb[0].mxu0  ;;  %v2053_v8 = vpop.f32.mrb[0].mxu1 }
 0x204   : > { %v2013_v45 = vadd.f32 %v2012_v40, %v681_v7  ;;  %v2014_v59 = vpop.f32.mrb[1].mxu0  ;;  %v2055_v9 = vpop.f32.mrb[1].mxu1  ;;  %v2343_v7 = vld [vmem:[%s4007_s12 + $0x10] sm:$0xff] }
 0x205   : > { %v2015_v60 = vadd.f32 %v2014_v59, %v685_v39  ;;  %v2016_v46 = vpop.f32.mrb[2].mxu0  ;;  %v2057_v10 = vpop.f32.mrb[2].mxu1  ;;  %v2349_v39 = vld [vmem:[%s4010_s11 + $0x10] sm:$0xff]  ;;  %v2344_v59 = vld [vmem:[%s4007_s12 + $0x18] sm:$0xff] }
 0x206   : > { %v2054_v11 = vadd.f32 %v2053_v8, %v2013_v45  ;;  %v2017_v12 = vpop.f32.mrb[3].mxu0  ;;  %v2058_v13 = vpop.f32.mrb[3].mxu1 }
 0x207   : > { %v2056_v14 = vadd.f32 %v2055_v9, %v2015_v60  ;;  %v2350_v9 = vld [vmem:[%s4010_s11 + $0x18] sm:$0xff]  ;;  %v2330_v12 = vmul.f32 %v2319_v37, %v3768_v22  ;;  %v2353_v13 = vsub.f32 %v2343_v7, %v2349_v39 }
 0x208   : > { %v2354_v19 = vsub.f32 %v2344_v59, %v2350_v9 }
 0x243   : > { %v2094_v17 = vpop.f32.mrb[4].mxu0  ;;  %v2135_v18 = vpop.f32.mrb[4].mxu1 }
 0x244   : > { %v2095_v23 = vadd.f32 %v2094_v17, %v2054_v11  ;;  %v2096_v24 = vpop.f32.mrb[5].mxu0  ;;  %v2137_v25 = vpop.f32.mrb[5].mxu1 }
 0x245   : > { %v2097_v28 = vadd.f32 %v2096_v24, %v2056_v14  ;;  %v2098_v29 = vpop.f32.mrb[6].mxu0  ;;  %v2139_v30 = vpop.f32.mrb[6].mxu1 }
 0x246   : > { %v2136_v31 = vadd.f32 %v2135_v18, %v2095_v23  ;;  %v2099_v34 = vpop.f32.mrb[7].mxu0  ;;  %v2140_v35 = vpop.f32.mrb[7].mxu1  ;;  %v2331_v18 = vmul.f32 %v2323_v5, %v3768_v22 }
 0x247   : > { %v2138_v38 = vadd.f32 %v2137_v25, %v2097_v28 }
 0x248   : > { %v2332_v43 = vadd.f32 %v2328_v32, %v2136_v31 }
 0x249   : > { %v2333_v44 = vadd.f32 %v2329_v41, %v2138_v38 }
 0x24a   : > { %v2355_v47 = vsub.f32 %v2351_v33, %v2332_v43 }
 0x24b   : > { %v2356_v48 = vsub.f32 %v2352_v42, %v2333_v44 }
 0x24c   : > { %v2359_v49 = vmul.f32 %v2355_v47, %v2355_v47 }
 0x24d   : > { %v2360_v50 = vmul.f32 %v2356_v48, %v2356_v48 }
 0x24f   : > { %v2363_v51 = vadd.f32 %v2360_v50, %v2359_v49 }
 0x283   : > { %v2176_v56 = vpop.f32.mrb[8].mxu0 }
 0x284   : > { %v2177_v57 = vadd.f32 %v2176_v56, %v689_v54  ;;  %v2217_v58 = vpop.f32.mrb[8].mxu1  ;;  %v2178_v61 = vpop.f32.mrb[9].mxu0 }
 0x285   : > { %v2179_v62 = vadd.f32 %v2178_v61, %v693_v55  ;;  %v2219_v63 = vpop.f32.mrb[9].mxu1  ;;  %v2180_v0 = vpop.f32.mrb[10].mxu0 }
 0x286   : > { %v2218_v1 = vadd.f32 %v2217_v58, %v2177_v57  ;;  %v2221_v2 = vpop.f32.mrb[10].mxu1  ;;  %v2181_v3 = vpop.f32.mrb[11].mxu0 }
 0x287   : > { %v2220_v4 = vadd.f32 %v2219_v63, %v2179_v62  ;;  %v2222_v6 = vpop.f32.mrb[11].mxu1 }
 0x2c3   : > { %v2258_v36 = vpop.f32.mrb[12].mxu0 }
 0x2c4   : > { %v2259_v40 = vadd.f32 %v2258_v36, %v2218_v1  ;;  %v2299_v8 = vpop.f32.mrb[12].mxu1  ;;  %v2260_v45 = vpop.f32.mrb[13].mxu0 }
 0x2c5   : > { %v2261_v60 = vadd.f32 %v2260_v45, %v2220_v4  ;;  %v2301_v46 = vpop.f32.mrb[13].mxu1  ;;  %v2262_v10 = vpop.f32.mrb[14].mxu0 }
 0x2c6   : > { %v2300_v11 = vadd.f32 %v2299_v8, %v2259_v40  ;;  %v2303_v14 = vpop.f32.mrb[14].mxu1  ;;  %v2263_v16 = vpop.f32.mrb[15].mxu0 }
 0x2c7   : > { %v2302_v17 = vadd.f32 %v2301_v46, %v2261_v60  ;;  %v2304_v15 = vpop.f32.mrb[15].mxu1 }
 0x2c8   : > { %v2334_v20 = vadd.f32 %v2330_v12, %v2300_v11 }
 0x2c9   : > { %v2335_v21 = vadd.f32 %v2331_v18, %v2302_v17 }
 0x2ca   : > { %v2357_v23 = vsub.f32 %v2353_v13, %v2334_v20 }
 0x2cb   : > { %v2358_v24 = vsub.f32 %v2354_v19, %v2335_v21 }
 0x2cc   : > { %v2361_v25 = vmul.f32 %v2357_v23, %v2357_v23 }
 0x2cd   : > { %v2362_v26 = vmul.f32 %v2358_v24, %v2358_v24 }
 0x2ce   : > { %v2364_v27 = vadd.f32 %v2363_v51, %v2361_v25 }
 0x2d0   : > { %v2365_v28 = vadd.f32 %v2364_v27, %v2362_v26 }
 0x2d2   : > { %2366 = vadd.xlane.f32.xlu0 %v2365_v28 }
 0x35f   : > { %v2367_v22 = vpop.xlane.xlu0 %2366 }
 0x360   : > { %2369 = vst.msk [vmem:[%s365_s21] sm:$0xff] %vm2368_vm0, %v2367_v22 }
 0x361 PF: > { %p15_p1 = scmp.ge.s32.totalorder %s3498_s26, 4   ;;  %s4083_s21 = smov %s3422_s22 }
 0x362   : > { %s4084_s22 = smov %s3426_s23  ;;  %s4085_s23 = smov %s3508_s29 }
 0x363   : > { %s4086_s24 = smov %s3498_s26  ;;  %17 = sbr.rel (!%p15_p1) target bundleno = 6 (0x6), region = 115 }
 0x36a   :  { %2389 = vsyncpa [#allocation3], 1 }
 0x36b   :  { %2391 = vsyncpa [#allocation3 + $0x1], 1 }
 0x36c   :  { %2392 = vsyncpa [#allocation5], 1 }

</bundles_post_ra>
